<compile_context>
chip_gen: v7x
topology: tpu7x:2x2x1
jax: 0.10.0
libtpu: 0.0.40
codegen_flags: <defaults>
</compile_context>

<pallas_src>
import jax
import jax.numpy as jnp
import numpy as np
from jax import lax
from jax.experimental import pallas as pl
from jax.experimental.pallas import tpu as pltpu

_NEG = -1e30


def _gat_kernel(x_hbm, adj_ref, assign_ref, w_ref, aux_ref, o_ref, h_scr, x_sem):
    """Grid step l in [0, L-1]: GAT layer l. Step L: GlobalAttention pooling + lin1 head."""
    l = pl.program_id(0)
    n_steps = pl.num_programs(0)            # L + 1
    last_gat = n_steps - 2                  # index of the last GAT layer

    # Step 0: DMA the (padded) input features straight into the resident carry.
    @pl.when(l == 0)
    def _():
        cp = pltpu.make_async_copy(x_hbm, h_scr, x_sem.at[0])
        cp.start()
        cp.wait()

    w = w_ref[0]                            # [D, D]  layer-l lin weight (or lin1 weight at step L)
    aux = aux_ref[0]                        # [8, D]  att_src/att_dst/bias (or gate_w/lin1_b)

    # ---- GAT layer steps ----
    @pl.when(l <= last_gat)
    def _():
        h = h_scr[...]                                              # [N, D]
        hw = jnp.dot(h, w, preferred_element_type=jnp.float32)      # [N, D]  (MXU)

        att_src_row = aux[0:1, :]                                   # [1, D]
        att_dst_row = aux[1:2, :]                                   # [1, D]
        bias_row = aux[2:3, :]                                      # [1, D]

        # Source logits: contract last dims -> [1, N] directly (no hw.T materialization).
        a_src = lax.dot_general(att_src_row, hw,
                                dimension_numbers=(((1,), (1,)), ((), ())),
                                preferred_element_type=jnp.float32)  # [1, N]
        a_dst = jnp.sum(hw * att_dst_row, axis=-1, keepdims=True)    # [N, 1]

        adj = adj_ref[...].astype(jnp.float32)                       # 0/1 mask (stored bf16)
        e = a_dst + a_src                                            # [N, N], e[i, j] (i=tgt, j=src)
        e = jnp.where(e > 0, e, 0.2 * e)                             # LeakyReLU(0.2)
        e = jnp.where(adj > 0, e, _NEG)                              # mask non-edges
        m = jnp.max(e, axis=-1, keepdims=True)                       # per-target row max
        p = jnp.exp(e - m) * adj                                     # unnormalized attention
        denom = jnp.sum(p, axis=-1, keepdims=True)
        inv = 1.0 / jnp.maximum(denom, 1e-30)                        # [N, 1]
        # Deferred softmax normalization: scale after the MXU matmul (N*D muls, not N^2 divs).
        out = jnp.dot(p, hw, preferred_element_type=jnp.float32) * inv + bias_row

        # ReLU only between GAT layers (BasicGNN applies no activation after the last conv).
        @pl.when(l < last_gat)
        def _():
            h_scr[...] = jnp.maximum(out, 0.0)

        @pl.when(l == last_gat)
        def _():
            h_scr[...] = out

    # ---- final step: GlobalAttention pooling + lin1 head ----
    @pl.when(l == n_steps - 1)
    def _():
        h = h_scr[...]                                               # final GAT output [N, D]
        gate_w_row = aux[0:1, :]                                     # [1, D]
        b1_row = aux[1:2, :]                                         # [1, D]
        assign = assign_ref[...]                                     # [G, N] graph one-hot

        # gate_nn bias omitted: the per-graph softmax is shift-invariant, so it cancels exactly.
        gate = lax.dot_general(gate_w_row, h,
                               dimension_numbers=(((1,), (1,)), ((), ())),
                               preferred_element_type=jnp.float32)    # [1, N]
        masked = jnp.where(assign > 0, gate, _NEG)                    # [G, N]
        m_g = jnp.max(masked, axis=-1, keepdims=True)                 # per-graph max (fix)
        wght = jnp.exp(masked - m_g) * assign                         # [G, N]
        den = jnp.sum(wght, axis=-1, keepdims=True)                   # [G, 1]
        inv = 1.0 / jnp.maximum(den, 1e-30)
        pooled = jnp.dot(wght, h, preferred_element_type=jnp.float32) * inv      # [G, D]
        o_ref[...] = jnp.dot(pooled, w, preferred_element_type=jnp.float32) + b1_row


def _round_up(x, m):
    return ((x + m - 1) // m) * m


def pack_gat_params(layer_weights, layer_att_src, layer_att_dst, layer_bias,
                    gate_w, lin1_w, lin1_b, num_features, hidden):
    """One-time parameter packing (padded + stacked) — hoisted out of the per-call path.

    Returns (w_stack [L+1, D, D], aux_stack [L+1, 8, D]); slice L holds the head
    (lin1 weight; gate vector / lin1 bias rows). Zero padding is exact.
    """
    L = len(layer_weights)
    D_pad = max(_round_up(num_features, 128), _round_up(hidden, 128))
    # TODO(synk): pad D to multiples of 256 once hidden > 128 (v6e/v7x 256-wide MXU).
    w_stack = np.zeros((L + 1, D_pad, D_pad), np.float32)
    aux_stack = np.zeros((L + 1, 8, D_pad), np.float32)
    for li in range(L):
        W = np.asarray(layer_weights[li], np.float32)
        w_stack[li, :W.shape[0], :W.shape[1]] = W
        aux_stack[li, 0, :hidden] = np.asarray(layer_att_src[li], np.float32)
        aux_stack[li, 1, :hidden] = np.asarray(layer_att_dst[li], np.float32)
        aux_stack[li, 2, :hidden] = np.asarray(layer_bias[li], np.float32)
    w_stack[L, :hidden, :hidden] = np.asarray(lin1_w, np.float32)
    aux_stack[L, 0, :hidden] = np.asarray(gate_w, np.float32)
    aux_stack[L, 1, :hidden] = np.asarray(lin1_b, np.float32)
    return jnp.asarray(w_stack), jnp.asarray(aux_stack)


def no_edge_attr_gat_forward(x, edge_index, batch, num_graphs, hidden, w_stack, aux_stack):
    """NoEdgeAttrGAT forward.

    x: [N, F]; edge_index: [2, E] (row0=source, row1=target); batch: [N] graph ids.
    w_stack/aux_stack from pack_gat_params. Returns [num_graphs, hidden] float32.
    """
    N, F = x.shape
    L = w_stack.shape[0] - 1
    D_pad = w_stack.shape[-1]
    N_pad = _round_up(max(N, 8), 128)
    G_pad = _round_up(max(num_graphs, 1), 8)
    f32 = jnp.float32

    src, dst = edge_index[0], edge_index[1]
    idx = jnp.arange(N)

    # ---- glue: dense, padded graph-structure tensors (packs all graphs into one node tile) ----
    x_p = jnp.zeros((N_pad, D_pad), f32).at[:N, :F].set(x.astype(f32))
    adj = jnp.zeros((N_pad, N_pad), f32)
    adj = adj.at[dst, src].set(1.0)                    # message j -> i lands at adj[i, j]
    adj = adj.at[idx, idx].set(1.0)                    # GATConv add_self_loops=True
    adj = adj.astype(jnp.bfloat16)                     # 0/1 mask: bf16 is exact, halves VMEM/DMA
    assign = jnp.zeros((G_pad, N_pad), f32).at[batch, idx].set(1.0)

    cost = pl.CostEstimate(
        flops=int(L * (2 * N_pad * D_pad * D_pad + 2 * N_pad * N_pad * D_pad
                       + 4 * N_pad * D_pad + 8 * N_pad * N_pad)
                  + 2 * N_pad * D_pad + 2 * G_pad * N_pad * D_pad
                  + 2 * G_pad * D_pad * D_pad + 6 * G_pad * N_pad),
        transcendentals=int(L * N_pad * N_pad + G_pad * N_pad),
        bytes_accessed=int(4 * N_pad * D_pad + 2 * N_pad * N_pad + 4 * G_pad * N_pad
                           + 4 * (L + 1) * (D_pad * D_pad + 8 * D_pad)
                           + 4 * G_pad * D_pad),
    )

    grid_spec = pltpu.PrefetchScalarGridSpec(
        num_scalar_prefetch=0,
        grid=(L + 1,),
        in_specs=[
            pl.BlockSpec(memory_space=pl.ANY),                       # x: DMA'd once into the carry
            pl.BlockSpec((N_pad, N_pad), lambda l: (0, 0),
                         pipeline_mode=pl.Buffered(1)),              # adjacency mask (1-buffered)
            pl.BlockSpec((G_pad, N_pad), lambda l: (0, 0),
                         pipeline_mode=pl.Buffered(1)),              # graph one-hot (1-buffered)
            pl.BlockSpec((1, D_pad, D_pad), lambda l: (l, 0, 0)),    # per-step weight (streamed)
            pl.BlockSpec((1, 8, D_pad), lambda l: (l, 0, 0)),        # per-step aux rows (streamed)
        ],
        out_specs=pl.BlockSpec((G_pad, D_pad), lambda l: (0, 0)),
        scratch_shapes=[pltpu.VMEM((N_pad, D_pad), jnp.float32),     # node-feature carry
                        pltpu.SemaphoreType.DMA((1,))],              # semaphore for the x -> carry DMA
    )

    out = pl.pallas_call(
        _gat_kernel,
        out_shape=jax.ShapeDtypeStruct((G_pad, D_pad), jnp.float32),
        grid_spec=grid_spec,
        compiler_params=pltpu.CompilerParams(
            dimension_semantics=("arbitrary",),       # carry across steps -> sequential axis
            vmem_limit_bytes=32 * 1024 * 1024),
        cost_estimate=cost,
    )(x_p, adj, assign, w_stack, aux_stack)

    return out[:num_graphs, :hidden]


def reference_forward(x, edge_index, batch, num_graphs,
                      layer_weights, layer_att_src, layer_att_dst, layer_bias,
                      gate_w, gate_b, lin1_w, lin1_b):
    """Pure-JAX reference of the same forward (unpadded, dense formulation)."""
    N = x.shape[0]
    src, dst = edge_index[0], edge_index[1]
    idx = jnp.arange(N)
    adj = jnp.zeros((N, N), jnp.float32).at[dst, src].set(1.0)
    adj = adj.at[idx, idx].set(1.0)
    h = x.astype(jnp.float32)
    L = len(layer_weights)
    for li in range(L):
        hw = h @ layer_weights[li]
        a_src = hw @ layer_att_src[li]
        a_dst = hw @ layer_att_dst[li]
        e = a_dst[:, None] + a_src[None, :]
        e = jnp.where(e > 0, e, 0.2 * e)
        e = jnp.where(adj > 0, e, -jnp.inf)
        alpha = jax.nn.softmax(e, axis=-1)
        h = alpha @ hw + layer_bias[li]
        if li < L - 1:
            h = jax.nn.relu(h)
    gate = h @ gate_w + gate_b                                    # [N]
    onehot = (batch[None, :] == jnp.arange(num_graphs)[:, None]).astype(jnp.float32)
    masked = jnp.where(onehot > 0, gate[None, :], -jnp.inf)
    wght = jax.nn.softmax(masked, axis=-1)                        # per-graph softmax
    pooled = wght @ h
    return pooled @ lin1_w + lin1_b


if __name__ == "__main__":
    num_features, hidden, num_layers = 16, 32, 2

    # Two small graphs (6 + 5 nodes), bidirectional edges within each graph.
    edges = [(0, 1), (1, 2), (2, 3), (3, 4), (4, 5), (5, 0),
             (6, 7), (7, 8), (8, 9), (9, 10), (10, 6)]
    src = [a for a, b in edges] + [b for a, b in edges]
    dst = [b for a, b in edges] + [a for a, b in edges]
    edge_index = jnp.array([src, dst], dtype=jnp.int32)           # [2, 22]
    batch = jnp.array([0] * 6 + [1] * 5, dtype=jnp.int32)         # [11]
    num_graphs = 2
    N = int(batch.shape[0])

    key = jax.random.PRNGKey(0)
    keys = jax.random.split(key, 4 * num_layers + 5)
    x = jax.random.normal(keys[0], (N, num_features), dtype=jnp.float32)

    layer_weights, layer_att_src, layer_att_dst, layer_bias = [], [], [], []
    kp = 1
    in_dim = num_features
    for _ in range(num_layers):
        layer_weights.append(
            jax.random.normal(keys[kp], (in_dim, hidden), jnp.float32) * (in_dim ** -0.5)); kp += 1
        layer_att_src.append(
            jax.random.normal(keys[kp], (hidden,), jnp.float32) * (hidden ** -0.5)); kp += 1
        layer_att_dst.append(
            jax.random.normal(keys[kp], (hidden,), jnp.float32) * (hidden ** -0.5)); kp += 1
        layer_bias.append(
            jax.random.normal(keys[kp], (hidden,), jnp.float32) * 0.1); kp += 1
        in_dim = hidden
    gate_w = jax.random.normal(keys[kp], (hidden,), jnp.float32) * (hidden ** -0.5); kp += 1
    gate_b = jax.random.normal(keys[kp], (), jnp.float32) * 0.1; kp += 1
    lin1_w = jax.random.normal(keys[kp], (hidden, hidden), jnp.float32) * (hidden ** -0.5); kp += 1
    lin1_b = jax.random.normal(keys[kp], (hidden,), jnp.float32) * 0.1; kp += 1

    # One-time parameter packing (hoisted out of the per-call path).
    w_stack, aux_stack = pack_gat_params(layer_weights, layer_att_src, layer_att_dst,
                                         layer_bias, gate_w, lin1_w, lin1_b,
                                         num_features, hidden)

    out = no_edge_attr_gat_forward(x, edge_index, batch, num_graphs, hidden,
                                   w_stack, aux_stack)
    out = jax.block_until_ready(out)

    ref = reference_forward(x, edge_index, batch, num_graphs,
                            layer_weights, layer_att_src, layer_att_dst, layer_bias,
                            gate_w, gate_b, lin1_w, lin1_b)
    np.testing.assert_allclose(np.asarray(out), np.asarray(ref), rtol=1e-4, atol=1e-4)

    assert out.shape == (num_graphs, hidden) and out.dtype == jnp.float32
    print("KERNEL_OK")
</pallas_src>

<mosaic_0001>
module attributes {stable_mosaic.version = 11 : i64} {
  func.func @_gat_kernel(%arg0: i32, %arg1: memref<128x128xf32, #tpu.memory_space<any>>, %arg2: memref<128x128xbf16, #tpu.memory_space<vmem>>, %arg3: memref<8x128xf32, #tpu.memory_space<vmem>>, %arg4: memref<1x128x128xf32, #tpu.memory_space<vmem>>, %arg5: memref<1x8x128xf32, #tpu.memory_space<vmem>>, %arg6: memref<8x128xf32, #tpu.memory_space<vmem>>, %arg7: memref<128x128xf32, #tpu.memory_space<vmem>>, %arg8: memref<1x!tpu.dma_semaphore, #tpu.memory_space<semaphore_mem>>) attributes {dimension_semantics = [#tpu.dimension_semantics<arbitrary>], iteration_bounds = array<i64: 3>, scalar_prefetch = 0 : i64, scratch_operands = 2 : i64, tpu.core_type = #tpu.core_type<tc>, window_params = [{}, {pipeline_mode = #tpu.pipeline_mode<synchronous>, transform_indices = @transform_1, window_bounds = array<i64: 128, 128>}, {pipeline_mode = #tpu.pipeline_mode<synchronous>, transform_indices = @transform_2, window_bounds = array<i64: 8, 128>}, {transform_indices = @transform_3, window_bounds = array<i64: 1, 128, 128>}, {transform_indices = @transform_4, window_bounds = array<i64: 1, 8, 128>}, {pipeline_mode = #tpu.pipeline_mode<synchronous>, transform_indices = @transform_5, window_bounds = array<i64: 8, 128>}]} {
    %c0_i32 = arith.constant 0 : i32
    %0 = arith.cmpi eq, %arg0, %c0_i32 : i32
    %1 = arith.extui %0 : i1 to i32
    %c0_i32_0 = arith.constant 0 : i32
    %2 = arith.cmpi ne, %1, %c0_i32_0 : i32
    scf.if %2 {
      %c0_i32_8 = arith.constant 0 : i32
      %13 = tpu.memref_slice %arg8[%c0_i32_8] : memref<1x!tpu.dma_semaphore, #tpu.memory_space<semaphore_mem>> -> memref<1x!tpu.dma_semaphore, #tpu.memory_space<semaphore_mem>>
      %14 = tpu.memref_squeeze %13 : memref<1x!tpu.dma_semaphore, #tpu.memory_space<semaphore_mem>> -> memref<!tpu.dma_semaphore, #tpu.memory_space<semaphore_mem>>
      tpu.enqueue_dma source(%arg1 : memref<128x128xf32, #tpu.memory_space<any>>) target(%arg7 : memref<128x128xf32, #tpu.memory_space<vmem>>) target_semaphore(%14 : memref<!tpu.dma_semaphore, #tpu.memory_space<semaphore_mem>>)
      %c0_i32_9 = arith.constant 0 : i32
      %15 = tpu.memref_slice %arg8[%c0_i32_9] : memref<1x!tpu.dma_semaphore, #tpu.memory_space<semaphore_mem>> -> memref<1x!tpu.dma_semaphore, #tpu.memory_space<semaphore_mem>>
      %16 = tpu.memref_squeeze %15 : memref<1x!tpu.dma_semaphore, #tpu.memory_space<semaphore_mem>> -> memref<!tpu.dma_semaphore, #tpu.memory_space<semaphore_mem>>
      tpu.wait_dma2 semaphore(%16 : memref<!tpu.dma_semaphore, #tpu.memory_space<semaphore_mem>>) src(%arg1 : memref<128x128xf32, #tpu.memory_space<any>>) dst(%arg7 : memref<128x128xf32, #tpu.memory_space<vmem>>)
    } else {
    }
    %c0 = arith.constant 0 : index
    %c0_1 = arith.constant 0 : index
    %c0_2 = arith.constant 0 : index
    %3 = vector.load %arg4[%c0, %c0_1, %c0_2] : memref<1x128x128xf32, #tpu.memory_space<vmem>>, vector<1x128x128xf32>
    %4 = vector.shape_cast %3 : vector<1x128x128xf32> to vector<128x128xf32>
    %c0_3 = arith.constant 0 : index
    %c0_4 = arith.constant 0 : index
    %c0_5 = arith.constant 0 : index
    %5 = vector.load %arg5[%c0_3, %c0_4, %c0_5] : memref<1x8x128xf32, #tpu.memory_space<vmem>>, vector<1x8x128xf32>
    %6 = vector.shape_cast %5 : vector<1x8x128xf32> to vector<8x128xf32>
    %c1_i32 = arith.constant 1 : i32
    %7 = arith.cmpi sle, %arg0, %c1_i32 : i32
    %8 = arith.extui %7 : i1 to i32
    %c0_i32_6 = arith.constant 0 : i32
    %9 = arith.cmpi ne, %8, %c0_i32_6 : i32
    scf.if %9 {
      %c0_8 = arith.constant 0 : index
      %c0_9 = arith.constant 0 : index
      %13 = vector.load %arg7[%c0_8, %c0_9] : memref<128x128xf32, #tpu.memory_space<vmem>>, vector<128x128xf32>
      %cst = arith.constant dense<0.000000e+00> : vector<128x128xf32>
      %14 = tpu.matmul %13, %4, %cst {dimension_numbers = #tpu.dot_dimension_numbers<[1], [0], [0], [1], [0, 0, 1, 1], [], []>} : vector<128x128xf32>, vector<128x128xf32>, vector<128x128xf32> -> vector<128x128xf32>
      %15 = vector.extract_strided_slice %6 {offsets = [0, 0], sizes = [1, 128], strides = [1, 1]} : vector<8x128xf32> to vector<1x128xf32>
      %16 = vector.extract_strided_slice %6 {offsets = [1, 0], sizes = [1, 128], strides = [1, 1]} : vector<8x128xf32> to vector<1x128xf32>
      %17 = vector.extract_strided_slice %6 {offsets = [2, 0], sizes = [1, 128], strides = [1, 1]} : vector<8x128xf32> to vector<1x128xf32>
      %cst_10 = arith.constant dense<0.000000e+00> : vector<1x128xf32>
      %18 = tpu.matmul %15, %14, %cst_10 {dimension_numbers = #tpu.dot_dimension_numbers<[1], [1], [0], [0], [0, 0, 1, 0], [], []>} : vector<1x128xf32>, vector<128x128xf32>, vector<1x128xf32> -> vector<1x128xf32>
      %19 = vector.broadcast %16 : vector<1x128xf32> to vector<128x128xf32>
      %20 = arith.mulf %14, %19 : vector<128x128xf32>
      %cst_11 = arith.constant dense<0.000000e+00> : vector<128xf32>
      %21 = vector.multi_reduction <add>, %20, %cst_11 [1] : vector<128x128xf32> to vector<128xf32>
      %22 = vector.shape_cast %21 : vector<128xf32> to vector<128x1xf32>
      %c0_12 = arith.constant 0 : index
      %c0_13 = arith.constant 0 : index
      %23 = vector.load %arg2[%c0_12, %c0_13] : memref<128x128xbf16, #tpu.memory_space<vmem>>, vector<128x128xbf16>
      %24 = arith.extf %23 : vector<128x128xbf16> to vector<128x128xf32>
      %25 = vector.broadcast %22 : vector<128x1xf32> to vector<128x128xf32>
      %26 = vector.broadcast %18 : vector<1x128xf32> to vector<128x128xf32>
      %27 = arith.addf %25, %26 : vector<128x128xf32>
      %cst_14 = arith.constant 0.000000e+00 : f32
      %28 = vector.broadcast %cst_14 : f32 to vector<128x128xf32>
      %29 = arith.cmpf ogt, %27, %28 : vector<128x128xf32>
      %cst_15 = arith.constant 2.000000e-01 : f32
      %30 = vector.broadcast %cst_15 : f32 to vector<128x128xf32>
      %31 = arith.mulf %30, %27 : vector<128x128xf32>
      %32 = arith.select %29, %27, %31 : vector<128x128xi1>, vector<128x128xf32>
      %cst_16 = arith.constant 0.000000e+00 : f32
      %33 = vector.broadcast %cst_16 : f32 to vector<128x128xf32>
      %34 = arith.cmpf ogt, %24, %33 : vector<128x128xf32>
      %cst_17 = arith.constant -1.000000e+30 : f32
      %35 = vector.broadcast %cst_17 : f32 to vector<128x128xf32>
      %36 = arith.select %34, %32, %35 : vector<128x128xi1>, vector<128x128xf32>
      %cst_18 = arith.constant dense<0xFF800000> : vector<128xf32>
      %37 = vector.multi_reduction <maximumf>, %36, %cst_18 [1] : vector<128x128xf32> to vector<128xf32>
      %38 = vector.shape_cast %37 : vector<128xf32> to vector<128x1xf32>
      %39 = vector.broadcast %38 : vector<128x1xf32> to vector<128x128xf32>
      %40 = arith.subf %36, %39 : vector<128x128xf32>
      %41 = math.exp %40 : vector<128x128xf32>
      %42 = arith.mulf %41, %24 : vector<128x128xf32>
      %cst_19 = arith.constant dense<0.000000e+00> : vector<128xf32>
      %43 = vector.multi_reduction <add>, %42, %cst_19 [1] : vector<128x128xf32> to vector<128xf32>
      %44 = vector.shape_cast %43 : vector<128xf32> to vector<128x1xf32>
      %cst_20 = arith.constant 1.000000e-30 : f32
      %45 = vector.broadcast %cst_20 : f32 to vector<128x1xf32>
      %46 = arith.maximumf %44, %45 : vector<128x1xf32>
      %cst_21 = arith.constant 1.000000e+00 : f32
      %47 = vector.broadcast %cst_21 : f32 to vector<128x1xf32>
      %48 = arith.divf %47, %46 : vector<128x1xf32>
      %cst_22 = arith.constant dense<0.000000e+00> : vector<128x128xf32>
      %49 = tpu.matmul %42, %14, %cst_22 {dimension_numbers = #tpu.dot_dimension_numbers<[1], [0], [0], [1], [0, 0, 1, 1], [], []>} : vector<128x128xf32>, vector<128x128xf32>, vector<128x128xf32> -> vector<128x128xf32>
      %50 = vector.broadcast %48 : vector<128x1xf32> to vector<128x128xf32>
      %51 = arith.mulf %49, %50 : vector<128x128xf32>
      %52 = vector.broadcast %17 : vector<1x128xf32> to vector<128x128xf32>
      %53 = arith.addf %51, %52 : vector<128x128xf32>
      %c1_i32_23 = arith.constant 1 : i32
      %54 = arith.cmpi slt, %arg0, %c1_i32_23 : i32
      %55 = arith.extui %54 : i1 to i32
      %c0_i32_24 = arith.constant 0 : i32
      %56 = arith.cmpi ne, %55, %c0_i32_24 : i32
      scf.if %56 {
        %cst_27 = arith.constant 0.000000e+00 : f32
        %60 = vector.broadcast %cst_27 : f32 to vector<128x128xf32>
        %61 = arith.maximumf %53, %60 : vector<128x128xf32>
        %c0_28 = arith.constant 0 : index
        %c0_29 = arith.constant 0 : index
        %62 = vector.load %arg7[%c0_28, %c0_29] : memref<128x128xf32, #tpu.memory_space<vmem>>, vector<128x128xf32>
        tpu.vector_store %arg7[%c0_28, %c0_29], %61 {strides = array<i32>} : memref<128x128xf32, #tpu.memory_space<vmem>>, vector<128x128xf32>,
      } else {
      }
      %c1_i32_25 = arith.constant 1 : i32
      %57 = arith.cmpi eq, %arg0, %c1_i32_25 : i32
      %58 = arith.extui %57 : i1 to i32
      %c0_i32_26 = arith.constant 0 : i32
      %59 = arith.cmpi ne, %58, %c0_i32_26 : i32
      scf.if %59 {
        %c0_27 = arith.constant 0 : index
        %c0_28 = arith.constant 0 : index
        %60 = vector.load %arg7[%c0_27, %c0_28] : memref<128x128xf32, #tpu.memory_space<vmem>>, vector<128x128xf32>
        tpu.vector_store %arg7[%c0_27, %c0_28], %53 {strides = array<i32>} : memref<128x128xf32, #tpu.memory_space<vmem>>, vector<128x128xf32>,
      } else {
      }
    } else {
    }
    %c2_i32 = arith.constant 2 : i32
    %10 = arith.cmpi eq, %arg0, %c2_i32 : i32
    %11 = arith.extui %10 : i1 to i32
    %c0_i32_7 = arith.constant 0 : i32
    %12 = arith.cmpi ne, %11, %c0_i32_7 : i32
    scf.if %12 {
      %c0_8 = arith.constant 0 : index
      %c0_9 = arith.constant 0 : index
      %13 = vector.load %arg7[%c0_8, %c0_9] : memref<128x128xf32, #tpu.memory_space<vmem>>, vector<128x128xf32>
      %14 = vector.extract_strided_slice %6 {offsets = [0, 0], sizes = [1, 128], strides = [1, 1]} : vector<8x128xf32> to vector<1x128xf32>
      %15 = vector.extract_strided_slice %6 {offsets = [1, 0], sizes = [1, 128], strides = [1, 1]} : vector<8x128xf32> to vector<1x128xf32>
      %c0_10 = arith.constant 0 : index
      %c0_11 = arith.constant 0 : index
      %16 = vector.load %arg3[%c0_10, %c0_11] : memref<8x128xf32, #tpu.memory_space<vmem>>, vector<8x128xf32>
      %cst = arith.constant dense<0.000000e+00> : vector<1x128xf32>
      %17 = tpu.matmul %14, %13, %cst {dimension_numbers = #tpu.dot_dimension_numbers<[1], [1], [0], [0], [0, 0, 1, 0], [], []>} : vector<1x128xf32>, vector<128x128xf32>, vector<1x128xf32> -> vector<1x128xf32>
      %cst_12 = arith.constant 0.000000e+00 : f32
      %18 = vector.broadcast %cst_12 : f32 to vector<8x128xf32>
      %19 = arith.cmpf ogt, %16, %18 : vector<8x128xf32>
      %cst_13 = arith.constant -1.000000e+30 : f32
      %20 = vector.shape_cast %17 : vector<1x128xf32> to vector<1x128xf32>
      %21 = vector.broadcast %20 : vector<1x128xf32> to vector<8x128xf32>
      %22 = vector.broadcast %cst_13 : f32 to vector<8x128xf32>
      %23 = arith.select %19, %21, %22 : vector<8x128xi1>, vector<8x128xf32>
      %cst_14 = arith.constant dense<0xFF800000> : vector<8xf32>
      %24 = vector.multi_reduction <maximumf>, %23, %cst_14 [1] : vector<8x128xf32> to vector<8xf32>
      %25 = vector.shape_cast %24 : vector<8xf32> to vector<8x1xf32>
      %26 = vector.broadcast %25 : vector<8x1xf32> to vector<8x128xf32>
      %27 = arith.subf %23, %26 : vector<8x128xf32>
      %28 = math.exp %27 : vector<8x128xf32>
      %29 = arith.mulf %28, %16 : vector<8x128xf32>
      %cst_15 = arith.constant dense<0.000000e+00> : vector<8xf32>
      %30 = vector.multi_reduction <add>, %29, %cst_15 [1] : vector<8x128xf32> to vector<8xf32>
      %31 = vector.shape_cast %30 : vector<8xf32> to vector<8x1xf32>
      %cst_16 = arith.constant 1.000000e-30 : f32
      %32 = vector.broadcast %cst_16 : f32 to vector<8x1xf32>
      %33 = arith.maximumf %31, %32 : vector<8x1xf32>
      %cst_17 = arith.constant 1.000000e+00 : f32
      %34 = vector.broadcast %cst_17 : f32 to vector<8x1xf32>
      %35 = arith.divf %34, %33 : vector<8x1xf32>
      %cst_18 = arith.constant dense<0.000000e+00> : vector<8x128xf32>
      %36 = tpu.matmul %29, %13, %cst_18 {dimension_numbers = #tpu.dot_dimension_numbers<[1], [0], [0], [1], [0, 0, 1, 1], [], []>} : vector<8x128xf32>, vector<128x128xf32>, vector<8x128xf32> -> vector<8x128xf32>
      %37 = vector.broadcast %35 : vector<8x1xf32> to vector<8x128xf32>
      %38 = arith.mulf %36, %37 : vector<8x128xf32>
      %cst_19 = arith.constant dense<0.000000e+00> : vector<8x128xf32>
      %39 = tpu.matmul %38, %4, %cst_19 {dimension_numbers = #tpu.dot_dimension_numbers<[1], [0], [0], [1], [0, 0, 1, 1], [], []>} : vector<8x128xf32>, vector<128x128xf32>, vector<8x128xf32> -> vector<8x128xf32>
      %40 = vector.broadcast %15 : vector<1x128xf32> to vector<8x128xf32>
      %41 = arith.addf %39, %40 : vector<8x128xf32>
      %c0_20 = arith.constant 0 : index
      %c0_21 = arith.constant 0 : index
      %42 = vector.load %arg6[%c0_20, %c0_21] : memref<8x128xf32, #tpu.memory_space<vmem>>, vector<8x128xf32>
      tpu.vector_store %arg6[%c0_20, %c0_21], %41 {strides = array<i32>} : memref<8x128xf32, #tpu.memory_space<vmem>>, vector<8x128xf32>,
    } else {
    }
    return
  }
  func.func @transform_1(%arg0: i32) -> (i32, i32) {
    %c0_i32 = arith.constant 0 : i32
    %c0_i32_0 = arith.constant 0 : i32
    %c0_i32_1 = arith.constant 0 : i32
    return %c0_i32, %c0_i32_0 : i32, i32
  }
  func.func @transform_2(%arg0: i32) -> (i32, i32) {
    %c0_i32 = arith.constant 0 : i32
    %c0_i32_0 = arith.constant 0 : i32
    %c0_i32_1 = arith.constant 0 : i32
    return %c0_i32, %c0_i32_0 : i32, i32
  }
  func.func @transform_3(%arg0: i32) -> (i32, i32, i32) {
    %c0_i32 = arith.constant 0 : i32
    %c0_i32_0 = arith.constant 0 : i32
    %c0_i32_1 = arith.constant 0 : i32
    return %arg0, %c0_i32, %c0_i32_0 : i32, i32, i32
  }
  func.func @transform_4(%arg0: i32) -> (i32, i32, i32) {
    %c0_i32 = arith.constant 0 : i32
    %c0_i32_0 = arith.constant 0 : i32
    %c0_i32_1 = arith.constant 0 : i32
    return %arg0, %c0_i32, %c0_i32_0 : i32, i32, i32
  }
  func.func @transform_5(%arg0: i32) -> (i32, i32) {
    %c0_i32 = arith.constant 0 : i32
    %c0_i32_0 = arith.constant 0 : i32
    %c0_i32_1 = arith.constant 0 : i32
    return %c0_i32, %c0_i32_0 : i32, i32
  }
}

</mosaic_0001>

<bundles_post_ra>
// kernel: tpu_custom_call.1
= control target key start
LH: loop header
LB: loop body
LE: loop exit
PB: predicated region body
PF: predicated region fallthrough
CT: control target
= control target key end

     0   :  { %s3237_s0 = inlined_call_operand.hbm [shape: f32[128,128], index: 0, kind: input, shape index: {}]   ;;  %s3238_s1 = inlined_call_operand.hbm [shape: bf16[128,128], index: 1, kind: input, shape index: {}]   ;;  %s3239_s2 = inlined_call_operand.hbm [shape: f32[8,128], index: 2, kind: input, shape index: {}]   ;;  %s3240_s3 = inlined_call_operand.hbm [shape: f32[3,128,128], index: 3, kind: input, shape index: {}]   ;;  %s3241_s4 = inlined_call_operand.hbm [shape: f32[3,8,128], index: 4, kind: input, shape index: {}]   ;;  %s3242_s5 = inlined_call_operand.hbm [shape: f32[8,128], index: 5, kind: output, shape index: {}]  }
   0x1   :  { %3259 = sst [smem:[#allocation21_spill]] %s3238_s1 }
   0x2   :  { %10 = vsyncpa [#allocation5], 0 }
   0x3   :  { %11 = vsyncpa [#allocation8], 0 }
   0x4   :  { %12 = vsyncpa [#allocation6], 0  ;;  %s2517_s18 = smov 0   ;;  %s2519_s19 = smov 0  }
   0x5   :  { %s2521_s20 = smov 0   ;;  %s2523_s21 = smov 0  }
   0x6 LB: > { %s2536_s22 = sadd.s32 4294967295, %s2469_s21   ;;  %s2539_s23 = sadd.s32 1, %s2469_s21   ;;  %s2469_s21 = sphi %s2523_s21, %s3319_s21   ;;  %s2465_s20 = sphi %s2521_s20, %s3318_s20   ;;  %s2461_s19 = sphi %s2519_s19, %s3317_s19   ;;  %s2457_s18 = sphi %s2517_s18, %s3316_s18  }
   0x7   : > { %s64_s24 = ssub.s32 %s2469_s21, %s2539_s23  ;;  %s67_s25 = sadd.s32 1, %s2465_s20 }
   0x8   : > { %p65_p0 = scmp.eq.s32.totalorder %s64_s24, 0  ;;  %p74_p1 = scmp.ne.s32.totalorder %s2465_s20, %s2461_s19 }
   0x9   : > { %p75_p2 = scmp.eq.s32.totalorder %s2469_s21, 0  ;;  %p80_p3 = scmp.ne.s32.totalorder %s2461_s19, %s2457_s18 }
   0xa   : > { %s2549_s26 = scalar_select %p65_p0, %s2465_s20, %s67_s25  }
   0xb   : > { %p2551_p4 = por %p75_p2, %p74_p1  ;;  %p3243_p5 = scmp.eq.s32.totalorder %s2536_s22, 0 }
   0xc   : > { %p1488_p6 = scmp.ge.s32.totalorder %s2469_s21, 1  ;;  %p138_p7 = scmp.lt.s32.totalorder %s2469_s21, 4 }
   0xd   : > { %p2560_p8 = por %p3243_p5, %p80_p3  ;;  %s2471_s30 = smov [#allocation4]  }
   0xe   : > { %p2564_p9 = pnand %p1488_p6, %p138_p7  ;;  %s150_s6 = sshll.u32 %s2471_s30, 4  ;;  %s151_s6 = int_to_ptr.vmem [resolvable:$true] %s150_s6 }
   0xf   : > { %s3261_s28 = scalar_select %p2560_p8, 1, 0 }
  0x10   : > { %s3262_s29 = scalar_select %p2564_p9, 1, 0 }
  0x11   : > { %p2115_p10 = pneg %p2564_p9  ;;  %p2131_p12 = scmp.lt.s32.totalorder %s2469_s21, 3 }
  0x12   : > { %s175_s8 = sand.u32 1, %s2469_s21   ;;  %s177_s9 = sand.u32 1, %s2465_s20  }
  0x13   : > { %p2572_p11 = pnand %p2115_p10, %p3243_p5  ;;  %p2581_p13 = pnand %p2131_p12, %p2551_p4 }
  0x14   : > { %s3265_s1 = sld [smem:[#allocation21_spill]] }
  0x15   : > { %s3264_s10 = scalar_select %p2581_p13, 1, 0 }
  0x16   : > { %p3247_p1 = pneg %p2572_p11 }
  0x1a   : > { %s2251_s13 = scalar_lea.hbm %s3265_s1, 1024 }
  0x1b   : > { %p2252_p0 = scmp.ne.s32.totalorder %s3265_s1, %s2251_s13  ;;  %p2258_p4 = scmp.lt.u32.totalorder %s2251_s13, %s3265_s1 }
  0x1d   : > { %p2254_p2 = pnand %p3247_p1, %p2252_p0 }
  0x1f   : > { %p2255_p3 = pneg %p2254_p2 }
  0x21   : > { %p2260_p6 = pnand %p2258_p4, %p2255_p3 }
  0x23   : > { %2263 = shalt.err (!%p2260_p6)
}
  0x24   : > { %s2264_s18 = scalar_lea.vmem %s151_s6, 1024  ;;  %p2272_p5 = scmp.lt.s32.totalorder %s151_s6, %s151_s6 }
  0x25   : > { %p2265_p7 = scmp.ne.s32.totalorder %s151_s6, %s2264_s18  ;;  %p2273_p8 = scmp.lt.s32.totalorder %s2264_s18, %s2264_s18 }
  0x27   : > { %p2267_p10 = pnand %p2265_p7, %p3247_p1  ;;  %p2274_p9 = por %p2273_p8, %p2272_p5 }
  0x29   : > { %p2268_p12 = pneg %p2267_p10 }
  0x2b   : > { %p2275_p13 = pnand %p2274_p9, %p2268_p12 }
  0x2d   : > { %2278 = shalt.err (!%p2275_p13)
}
  0x2e   : > { %s2472_s24 = smov 64   ;;  %s2473_s25 = smov 4  }
  0x2f   : > { %2118 = dma.hbm_to_vmem [thread:$0]  (!%p2572_p11), %s3265_s1, 1024, %s151_s6, [#allocation5], %s2472_s24, %s2472_s24, %s2473_s25  }
  0x30   : > { %s1492_s11 = sshll.u32 %s177_s9, 7  ;;  %s1512_s12 = sshll.u32 %s2469_s21, 11 }
  0x31   : > { %s2613_s15 = scalar_lea.hbm %s3240_s3, %s1512_s12  ;;  %s179_s16 = scalar_lea.vmem [#allocation9], %s1492_s11 }
  0x32   : > { %s186_s17 = sshll.u32 %s179_s16, 4  ;;  %s2617_s18 = scalar_lea.sflag [#allocation5], %s175_s8  ;;  %s2615_s17 = int_to_ptr.vmem [resolvable:$true] %s186_s17 }
  0x33   : > { %s2279_s27 = scalar_lea.hbm %s2613_s15, 2048  ;;  %p3266_p8 = scmp.ne.s32.totalorder %s3264_s10, 0 }
  0x34   : > { %p2280_p5 = scmp.ne.s32.totalorder %s2613_s15, %s2279_s27  ;;  %s2284_s25 = scalar_lea.hbm %s3240_s3, 6144 }
  0x35   : > { %p3248_p9 = pneg %p3266_p8  ;;  %p2285_p2 = scmp.lt.u32.totalorder %s2613_s15, %s3240_s3 }
  0x36   : > { %p2286_p3 = scmp.lt.u32.totalorder %s2284_s25, %s2279_s27  ;;  %p2288_p6 = scmp.lt.u32.totalorder %s2279_s27, %s2613_s15 }
  0x37   : > { %p2282_p13 = pnand %p3248_p9, %p2280_p5 }
  0x38   : > { %p2287_p4 = por %p2286_p3, %p2285_p2 }
  0x39   : > { %p2283_p0 = pneg %p2282_p13 }
  0x3a   : > { %p2289_p7 = por %p2288_p6, %p2287_p4 }
  0x3c   : > { %p2290_p10 = pnand %p2289_p7, %p2283_p0 }
  0x3e   : > { %2293 = shalt.err (!%p2290_p10)
}
  0x3f   : > { %s2294_s8 = scalar_lea.vmem %s2615_s17, 2048  ;;  %s2474_s11 = smov [#allocation9]  }
  0x40   : > { %p2295_p12 = scmp.ne.s32.totalorder %s2615_s17, %s2294_s8  ;;  %s2299_s13 = sshll.u32 %s2474_s11, 4  ;;  %s2300_s13 = int_to_ptr.vmem [resolvable:$false] %s2299_s13 }
  0x41   : > { %s2301_s14 = scalar_lea.vmem %s2300_s13, 4096  ;;  %p2302_p1 = scmp.lt.s32.totalorder %s2615_s17, %s2300_s13 }
  0x42   : > { %p2297_p5 = pnand %p2295_p12, %p3248_p9  ;;  %p2303_p2 = scmp.lt.s32.totalorder %s2301_s14, %s2294_s8 }
  0x44   : > { %p2298_p13 = pneg %p2297_p5  ;;  %p2304_p3 = por %p2303_p2, %p2302_p1 }
  0x46   : > { %p2305_p4 = pnand %p2304_p3, %p2298_p13 }
  0x48   : > { %2308 = shalt.err (!%p2305_p4)
}
  0x49   : > { %s2475_s16 = smov 128   ;;  %s2476_s27 = smov 8  }
  0x4a   : > { %2125 = dma.hbm_to_vmem [thread:$0]  (!%p3266_p8), %s2613_s15, 2048, %s2615_s17, %s2617_s18, %s2475_s16, %s2475_s16, %s2476_s27  }
  0x4b   : > { %s1495_s6 = sshll.u32 %s177_s9, 3  ;;  %s2477_s24 = smov [#allocation7]  }
  0x4c   : > { %s164_s25 = sshll.u32 %s2477_s24, 4  ;;  %s1496_s30 = sshll.u32 %s2469_s21, 7  ;;  %s165_s25 = int_to_ptr.vmem [resolvable:$true] %s164_s25 }
  0x4d   : > { %s2309_s11 = scalar_lea.hbm %s3239_s2, 128  ;;  %p3267_p0 = pneg %p2572_p11 }
  0x4e   : > { %p2310_p1 = scmp.ne.s32.totalorder %s3239_s2, %s2309_s11  ;;  %p2316_p10 = scmp.lt.u32.totalorder %s2309_s11, %s3239_s2 }
  0x50   : > { %p2312_p6 = pnand %p2310_p1, %p3267_p0 }
  0x52   : > { %p2313_p7 = pneg %p2312_p6 }
  0x54   : > { %p2318_p12 = pnand %p2316_p10, %p2313_p7 }
  0x56   : > { %2321 = shalt.err (!%p2318_p12)
}
  0x57   : > { %s2322_s9 = scalar_lea.vmem %s165_s25, 128  ;;  %p3268_p13 = pmov %p3267_p0 }
  0x58   : > { %p2323_p5 = scmp.ne.s32.totalorder %s165_s25, %s2322_s9  ;;  %p2330_p4 = scmp.lt.s32.totalorder %s165_s25, %s165_s25 }
  0x59   : > { %p2331_p9 = scmp.lt.s32.totalorder %s2322_s9, %s2322_s9 }
  0x5a   : > { %p2325_p2 = pnand %p2323_p5, %p3268_p13 }
  0x5b   : > { %p2332_p8 = por %p2331_p9, %p2330_p4 }
  0x5c   : > { %p2326_p3 = pneg %p2325_p2 }
  0x5e   : > { %p2333_p0 = pnand %p2332_p8, %p2326_p3 }
  0x60   : > { %2336 = shalt.err (!%p2333_p0)
}
  0x61   : > { %2121 = dma.hbm_to_vmem [thread:$0]  (!%p2572_p11), %s3239_s2, 128, %s165_s25, [#allocation8]  }
  0x62   : > { %s2671_s27 = scalar_lea.hbm %s3241_s4, %s1496_s30  ;;  %s200_s24 = scalar_lea.vmem [#allocation10], %s1495_s6 }
  0x63   : > { %s207_s12 = sshll.u32 %s200_s24, 4  ;;  %s2337_s8 = scalar_lea.hbm %s2671_s27, 128  ;;  %s208_s12 = int_to_ptr.vmem [resolvable:$true] %s207_s12 }
  0x64   : > { %p2338_p8 = scmp.ne.s32.totalorder %s2671_s27, %s2337_s8  ;;  %p3269_p9 = scmp.ne.s32.totalorder %s3264_s10, 0 }
  0x65   : > { %s2342_s11 = scalar_lea.hbm %s3241_s4, 384  ;;  %p2343_p11 = scmp.lt.u32.totalorder %s2671_s27, %s3241_s4 }
  0x66   : > { %p3270_p1 = pneg %p3269_p9  ;;  %p2344_p10 = scmp.lt.u32.totalorder %s2342_s11, %s2337_s8 }
  0x67   : > { %p2346_p5 = scmp.lt.u32.totalorder %s2337_s8, %s2671_s27 }
  0x68   : > { %p2340_p6 = pnand %p2338_p8, %p3270_p1  ;;  %p2345_p12 = por %p2344_p10, %p2343_p11 }
  0x6a   : > { %p2341_p7 = pneg %p2340_p6  ;;  %p2347_p13 = por %p2346_p5, %p2345_p12 }
  0x6c   : > { %p2348_p2 = pnand %p2347_p13, %p2341_p7 }
  0x6e   : > { %2351 = shalt.err (!%p2348_p2)
}
  0x6f   : > { %s2352_s6 = scalar_lea.vmem %s208_s12, 128  ;;  %p3271_p4 = pmov %p3270_p1 }
  0x70   : > { %p2353_p3 = scmp.ne.s32.totalorder %s208_s12, %s2352_s6  ;;  %s2478_s14 = smov [#allocation10]  }
  0x71   : > { %s2357_s15 = sshll.u32 %s2478_s14, 4  ;;  %s2358_s15 = int_to_ptr.vmem [resolvable:$false] %s2357_s15 }
  0x72   : > { %p2355_p0 = pnand %p2353_p3, %p3271_p4  ;;  %s2359_s9 = scalar_lea.vmem %s2358_s15, 256 }
  0x73   : > { %p2360_p1 = scmp.lt.s32.totalorder %s208_s12, %s2358_s15  ;;  %p2361_p6 = scmp.lt.s32.totalorder %s2359_s9, %s2352_s6 }
  0x74   : > { %p2356_p8 = pneg %p2355_p0 }
  0x75   : > { %p2362_p10 = por %p2361_p6, %p2360_p1 }
  0x77   : > { %p2363_p11 = pnand %p2362_p10, %p2356_p8 }
  0x79   : > { %2366 = shalt.err (!%p2363_p11)
}
  0x7a   : > { %2128 = dma.hbm_to_vmem [thread:$0]  (!%p3269_p9), %s2671_s27, 128, %s208_s12, %s2617_s18  }
  0x7b   : > { %p3272_p7 = scmp.ne.s32.totalorder %s3262_s29, 0 }
  0x7c   : > { %p3273_p12 = scmp.eq.s32.totalorder (!%p3272_p7), %s2536_s22, 0 }
  0x7d   : > { %216 = sbr.rel (%p3272_p7) target bundleno = 2015 (0x7df), region = 36 }
  0x84   : > { %2436 = dma.done.wait (%p3273_p12), [#allocation5], 1024   ;;  %p3274_p5 = pmov %p3273_p12 }
  0x86   : > { %2438 = vsyncadd (%p3274_p5), [#allocation5], 4294966272  ;;  %p3275_p13 = pmov %p3274_p5 }
  0x87   : > { %p3276_p2 = pmov %p3274_p5 }
  0x88   : > { %2440 = dma.done.wait (%p3275_p13), [#allocation8], 128  }
  0x89   : > { %2442 = vsyncadd (%p3276_p2), [#allocation8], 4294967168  ;;  %s226_s10 = sand.u32 1, %s2536_s22   ;;  %s228_s18 = sand.u32 1, %s2461_s19  }
  0x8a   : > { %s1500_s21 = sshll.u32 %s228_s18, 7  ;;  %s227_s29 = scalar_lea.sflag [#allocation5], %s226_s10 }
  0x8b   : > { %s2705_s17 = scalar_lea.vmem [#allocation9], %s1500_s21  ;;  %p3277_p9 = scmp.ne.s32.totalorder %s3261_s28, 0 }
  0x8d   : > { %2444 = dma.done.wait (%p3277_p9), %s227_s29, 2176  }
  0x8e   : > { %2446 = vsyncadd (%p3277_p9), %s227_s29, 4294965120  ;;  %s2711_s1 = sshll.u32 %s228_s18, 3  ;;  %s2479_s16 = smov [#allocation2]  }
  0x8f   : > { %s275_s27 = sshll.u32 %s2479_s16, 4  ;;  %s2367_s8 = scalar_lea.hbm %s3237_s0, 2048  ;;  %s276_s27 = int_to_ptr.vmem [resolvable:$true] %s275_s27 }
  0x90   : > { %p2368_p3 = scmp.ne.s32.totalorder %s3237_s0, %s2367_s8  ;;  %p3278_p4 = pmov %p3276_p2 }
  0x91   : > { %p2373_p1 = scmp.lt.u32.totalorder %s2367_s8, %s3237_s0 }
  0x92   : > { %p2369_p0 = pnand %p2368_p3, %p3278_p4 }
  0x94   : > { %p2370_p8 = pneg %p2369_p0 }
  0x96   : > { %p2375_p6 = pnand %p2373_p1, %p2370_p8 }
  0x98   : > { %2378 = shalt.err (!%p2375_p6)  }
  0x99   : > { %s2379_s13 = scalar_lea.vmem %s276_s27, 2048  ;;  %p3279_p11 = pmov %p3276_p2 }
  0x9a   : > { %p2380_p10 = scmp.ne.s32.totalorder %s276_s27, %s2379_s13  ;;  %p2386_p5 = scmp.lt.s32.totalorder %s276_s27, %s276_s27 }
  0x9b   : > { %p2387_p13 = scmp.lt.s32.totalorder %s2379_s13, %s2379_s13 }
  0x9c   : > { %p2381_p7 = pnand %p2380_p10, %p3279_p11 }
  0x9d   : > { %p2388_p2 = por %p2387_p13, %p2386_p5 }
  0x9e   : > { %p2382_p12 = pneg %p2381_p7 }
  0xa0   : > { %p2389_p9 = pnand %p2388_p2, %p2382_p12 }
  0xa2   : > { %2392 = shalt.err (!%p2389_p9)  }
  0xa3   : > { %p3280_p3 = pmov %p3278_p4  ;;  %s239_s14 = scalar_lea.vmem [#allocation10], %s2711_s1 }
  0xa5   : > { %2109 = dma.hbm_to_vmem [thread:$0]  (%p3280_p3), %s3237_s0, 2048, %s276_s27, [#allocation3] }
  0xa6   : > { %p3281_p4 = pmov %p3280_p3 }
  0xa7   : > { %p3282_p0 = pmov %p3280_p3 }
  0xa8   : > { %2448 = dma.done.wait (%p3281_p4), [#allocation3], 2048 }
  0xa9   : > { %2450 = vsyncadd (%p3282_p0), [#allocation3], 4294965248  ;;  %v2737_v0 = vld [vmem:[%s2705_s17] sm:$0xff]  ;;  %v2740_v1 = vld [vmem:[%s2705_s17 + $0x8] sm:$0xff]  ;;  %p1503_p8 = scmp.gt.s32.totalorder %s2536_s22, 1 }
  0xaa   : > { %v2743_v2 = vld [vmem:[%s2705_s17 + $0x10] sm:$0xff]  ;;  %v2746_v3 = vld [vmem:[%s2705_s17 + $0x18] sm:$0xff]  ;;  %v2749_v4 = vld [vmem:[%s2705_s17 + $0x20] sm:$0xff]  ;;  %v1936_v17 = vpack.c.bf16 (!%p1503_p8), %v2740_v1, %v2737_v0  ;;  %v2480_v41 = vmov (!%p1503_p8), 0.0|0.0   ;;  %vm2481_vm0 = vmmov (!%p1503_p8), 0   ;;  %v2482_v42 = vmov (!%p1503_p8), 0.0  }
  0xab   : > { %v2752_v5 = vld [vmem:[%s2705_s17 + $0x28] sm:$0xff]  ;;  %v2755_v6 = vld [vmem:[%s2705_s17 + $0x30] sm:$0xff]  ;;  %v2758_v7 = vld [vmem:[%s2705_s17 + $0x38] sm:$0xff]  ;;  %302 = sbr.rel (%p1503_p8) target bundleno = 1120 (0x460), region = 64  ;;  %v1940_v18 = vpack.c.bf16 (!%p1503_p8), %v2746_v3, %v2743_v2  ;;  %1968 = vmatprep.subr.bf16.mxu1 (!%p1503_p8), %v2480_v41  ;;  %1772 = vmatprep.mubr.msk.f32.mxu1 (!%p1503_p8), %vm2481_vm0, %v2482_v42  ;;  %v534_v43 = vlaneseq (!%p1503_p8)  ;;  %p1504_p1 = scmp.ge.s32.totalorder (!%p1503_p8), %s2536_s22, 1 }
  0xac   : > { %v2761_v8 = vld [vmem:[%s2705_s17 + $0x40] sm:$0xff]  ;;  %v2764_v9 = vld [vmem:[%s2705_s17 + $0x48] sm:$0xff]  ;;  %v2767_v10 = vld [vmem:[%s2705_s17 + $0x50] sm:$0xff]  ;;  %1937 = vmatprep.subr.bf16.mxu0 (!%p1503_p8), %v1936_v17  ;;  %v1944_v20 = vpack.c.bf16 (!%p1503_p8), %v2752_v5, %v2749_v4  ;;  %v1948_v21 = vpack.c.bf16 (!%p1503_p8), %v2758_v7, %v2755_v6 }
  0xad   : > { %v2770_v11 = vld [vmem:[%s2705_s17 + $0x58] sm:$0xff]  ;;  %v2773_v12 = vld [vmem:[%s2705_s17 + $0x60] sm:$0xff]  ;;  %v2776_v13 = vld [vmem:[%s2705_s17 + $0x68] sm:$0xff]  ;;  %1939 = vmatpush3.bf16.msra.mxu0 (!%p1503_p8), %v1936_v17  ;;  %v1952_v22 = vpack.c.bf16 (!%p1503_p8), %v2764_v9, %v2761_v8  ;;  %v2804_v44 = vshrl.u32 (!%p1503_p8), %v534_v43, 7 }
  0xae   : > { %v2779_v14 = vld [vmem:[%s2705_s17 + $0x70] sm:$0xff]  ;;  %v2782_v15 = vld [vmem:[%s2705_s17 + $0x78] sm:$0xff]  ;;  %v2784_v16 = vld [vmem:[%s239_s14] sm:$0xff]  ;;  %1941 = vmatprep.subr.bf16.mxu0 (!%p1503_p8), %v1940_v18  ;;  %v1956_v23 = vpack.c.bf16 (!%p1503_p8), %v2770_v11, %v2767_v10  ;;  %v1960_v24 = vpack.c.bf16 (!%p1503_p8), %v2776_v13, %v2773_v12 }
  0xaf   : > { %v303_v19 = vld [vmem:[#allocation2] sm:$0xff] (!%p1503_p8)  ;;  %v1964_v25 = vpack.c.bf16 (!%p1503_p8), %v2782_v15, %v2779_v14  ;;  %v304_v26 = vld [vmem:[#allocation2 + $0x8] sm:$0xff] (!%p1503_p8)  ;;  %v305_v27 = vld [vmem:[#allocation2 + $0x10] sm:$0xff] (!%p1503_p8)  ;;  %v536_v45 = vsub.s32 (!%p1503_p8), 1, %v2804_v44 }
  0xb0   : > { %1716 = vmatprep.mubr.f32.mxu0 (!%p1503_p8), %v303_v19  ;;  %v306_v28 = vld [vmem:[#allocation2 + $0x18] sm:$0xff] (!%p1503_p8)  ;;  %v307_v29 = vld [vmem:[#allocation2 + $0x20] sm:$0xff] (!%p1503_p8)  ;;  %v308_v30 = vld [vmem:[#allocation2 + $0x28] sm:$0xff] (!%p1503_p8) }
  0xb1   : > { %1943 = vmatpush3.bf16.msra.mxu0 (!%p1503_p8), %v1940_v18  ;;  %v309_v31 = vld [vmem:[#allocation2 + $0x30] sm:$0xff] (!%p1503_p8)  ;;  %v310_v32 = vld [vmem:[#allocation2 + $0x38] sm:$0xff] (!%p1503_p8)  ;;  %v311_v33 = vld [vmem:[#allocation2 + $0x40] sm:$0xff] (!%p1503_p8)  ;;  %v2808_v46 = vrot.slane (!%p1503_p8), %v2784_v16, %v536_v45  ;;  %v620_v45 = vsub.s32 (!%p1503_p8), 0, %v2804_v44 }
  0xb2   : > { %1945 = vmatprep.subr.bf16.mxu0 %v1944_v20  ;;  %v312_v34 = vld [vmem:[#allocation2 + $0x48] sm:$0xff]  ;;  %v313_v35 = vld [vmem:[#allocation2 + $0x50] sm:$0xff]  ;;  %v314_v36 = vld [vmem:[#allocation2 + $0x58] sm:$0xff] }
  0xb3   : > { %v315_v37 = vld [vmem:[#allocation2 + $0x60] sm:$0xff]  ;;  %v316_v38 = vld [vmem:[#allocation2 + $0x68] sm:$0xff]  ;;  %v317_v39 = vld [vmem:[#allocation2 + $0x70] sm:$0xff] }
  0xb4   : > { %v318_v40 = vld [vmem:[#allocation2 + $0x78] sm:$0xff]  ;;  %v2834_v43 = vld [vmem:[#allocation4] sm:$0xff]  }
  0xb5   : > { %1947 = vmatpush3.bf16.msra.mxu0 %v1944_v20 }
  0xb6   : > { %1949 = vmatprep.subr.bf16.mxu0 %v1948_v21 }
  0xb9   : > { %1951 = vmatpush3.bf16.msra.mxu0 %v1948_v21 }
  0xba   : > { %1953 = vmatprep.subr.bf16.mxu0 %v1952_v22 }
  0xbd   : > { %1955 = vmatpush3.bf16.msra.mxu0 %v1952_v22 }
  0xbe   : > { %1957 = vmatprep.subr.bf16.mxu0 %v1956_v23 }
  0xc1   : > { %1959 = vmatpush3.bf16.msra.mxu0 %v1956_v23 }
  0xc2   : > { %1961 = vmatprep.subr.bf16.mxu0 %v1960_v24 }
  0xc5   : > { %1963 = vmatpush3.bf16.msra.mxu0 %v1960_v24 }
  0xc6   : > { %1965 = vmatprep.subr.bf16.mxu0 %v1964_v25 }
  0xc9   : > { %1967 = vmatpush3.bf16.msra.mxu0 %v1964_v25 }
  0xcc   : > { %1717 = vmatmul.mubr.f32.vlgmr.msra.gmra.mrb[0].mxu0 %v304_v26 }
  0xcd   : > { %1719 = vmatprep.mubr.f32.mxu0 %v305_v27 }
  0xd0   : > { %1720 = vmatmul.mubr.f32.gmra.mrb[2].mxu0 %v306_v28 }
  0xd1   : > { %1722 = vmatprep.mubr.f32.mxu0 %v307_v29 }
  0xd4   : > { %1723 = vmatmul.mubr.f32.gmra.mrb[4].mxu0 %v308_v30 }
  0xd5   : > { %1725 = vmatprep.mubr.f32.mxu0 %v309_v31 }
  0xd8   : > { %1726 = vmatmul.mubr.f32.gmra.mrb[6].mxu0 %v310_v32 }
  0xd9   : > { %1728 = vmatprep.mubr.f32.mxu0 %v311_v33 }
  0xdc   : > { %1729 = vmatmul.mubr.f32.gmra.mrb[8].mxu0 %v312_v34 }
  0xdd   : > { %1731 = vmatprep.mubr.f32.mxu0 %v313_v35 }
  0xe0   : > { %1732 = vmatmul.mubr.f32.gmra.mrb[10].mxu0 %v314_v36 }
  0xe1   : > { %1734 = vmatprep.mubr.f32.mxu0 %v315_v37 }
  0xe4   : > { %1735 = vmatmul.mubr.f32.gmra.mrb[12].mxu0 %v316_v38 }
  0xe5   : > { %1737 = vmatprep.mubr.f32.mxu0 %v317_v39 }
  0xe8   : > { %1738 = vmatmul.mubr.f32.gmra.mrb[14].mxu0 %v318_v40 }
 0x19f   : > { %v1718_v47 = vpop.f32.mrb[0].mxu0 }
 0x1a0   : > { %v385_v48 = vpop.f32.mrb[1].mxu0  ;;  %v539_v54 = vmul.f32 %v1718_v47, %v2808_v46 }
 0x1a1   : > { %v1969_v49 = vpack.c.bf16 %v1718_v47, %v385_v48  ;;  %v538_v50 = vmul.f32 %v2808_v46, %v385_v48  ;;  %v1516_v47 = vunpack.c.h.bf16 %v2834_v43 }
 0x1a3   : > { %554 = vadd.xlane.f32.xlu0 %v538_v50  ;;  %v1721_v51 = vpop.f32.mrb[2].mxu0  ;;  %1970 = vmatpush3.bf16.xpose.msra.mxu1 %v1969_v49  ;;  %v2840_v50 = vld [vmem:[#allocation4 + $0x10] sm:$0xff]   ;;  %vm2847_vm1 = vcmp.gt.f32.partialorder %v1516_v47, 0.0 }
 0x1a4   : > { %1993 = vmatprep.subr.bf16.mxu0 %v1969_v49  ;;  %v395_v52 = vpop.f32.mrb[3].mxu0  ;;  %1971 = vmatprep.subr.bf16.mxu1 %v2480_v41  ;;  %v541_v56 = vmul.f32 %v1721_v51, %v2808_v46 }
 0x1a5   : > { %v1972_v53 = vpack.c.bf16 %v1721_v51, %v395_v52  ;;  %1995 = vmatpush3.bf16.msra.mxu0 %v1969_v49  ;;  %v540_v55 = vmul.f32 %v2808_v46, %v395_v52  ;;  %v2838_v49 = vld [vmem:[#allocation4 + $0x8] sm:$0xff]  }
 0x1a7   : > { %556 = vadd.xlane.f32.xlu0 %v539_v54  ;;  %558 = vadd.xlane.f32.xlu1 %v540_v55  ;;  %v1724_v57 = vpop.f32.mrb[4].mxu0 }
 0x1a8   : > { %1997 = vmatprep.subr.bf16.mxu0 %v1972_v53  ;;  %v405_v58 = vpop.f32.mrb[5].mxu0  ;;  %v543_v61 = vmul.f32 %v1724_v57, %v2808_v46 }
 0x1a9   : > { %1999 = vmatpush3.bf16.msra.mxu0 %v1972_v53  ;;  %v1975_v59 = vpack.c.bf16 %v1724_v57, %v405_v58  ;;  %v542_v60 = vmul.f32 %v2808_v46, %v405_v58  ;;  %v1519_v57 = vunpack.c.l.bf16 %v2838_v49  ;;  %v1524_v58 = vunpack.c.h.bf16 %v2840_v50 }
 0x1ab   : > { %560 = vadd.xlane.f32.xlu1 %v541_v56  ;;  %1973 = vmatpush3.bf16.xpose.msra.mxu1 %v1972_v53  ;;  %v1727_v62 = vpop.f32.mrb[6].mxu0  ;;  %v1520_v56 = vunpack.c.h.bf16 %v2838_v49  ;;  %vm2875_vm8 = vcmp.gt.f32.partialorder %v1519_v57, 0.0  ;;  %vm2896_vm11 = vcmp.gt.f32.partialorder %v1524_v58, 0.0 }
 0x1ac   : > { %2001 = vmatprep.subr.bf16.mxu0 %v1975_v59  ;;  %1974 = vmatprep.subr.bf16.mxu1 %v2480_v41  ;;  %v415_v63 = vpop.f32.mrb[7].mxu0  ;;  %v545_v19 = vmul.f32 %v1727_v62, %v2808_v46 }
 0x1ad   : > { %562 = vadd.xlane.f32.xlu0 %v542_v60  ;;  %2003 = vmatpush3.bf16.msra.mxu0 %v1975_v59  ;;  %v1978_v17 = vpack.c.bf16 %v1727_v62, %v415_v63  ;;  %v544_v18 = vmul.f32 %v2808_v46, %v415_v63  ;;  %vm2869_vm7 = vcmp.gt.f32.partialorder %v1520_v56, 0.0 }
 0x1af   : > { %564 = vadd.xlane.f32.xlu1 %v543_v61  ;;  %2005 = vmatprep.subr.bf16.mxu0 %v1978_v17  ;;  %v1730_v20 = vpop.f32.mrb[8].mxu0 }
 0x1b0   : > { %v425_v21 = vpop.f32.mrb[9].mxu0  ;;  %v547_v24 = vmul.f32 %v1730_v20, %v2808_v46 }
 0x1b1   : > { %566 = vadd.xlane.f32.xlu0 %v544_v18  ;;  %2007 = vmatpush3.bf16.msra.mxu0 %v1978_v17  ;;  %v1981_v22 = vpack.c.bf16 %v1730_v20, %v425_v21  ;;  %v546_v23 = vmul.f32 %v2808_v46, %v425_v21 }
 0x1b3   : > { %1976 = vmatpush3.bf16.xpose.msra.mxu1 %v1975_v59  ;;  %568 = vadd.xlane.f32.xlu1 %v545_v19  ;;  %v1733_v25 = vpop.f32.mrb[10].mxu0  ;;  %v3256_v19 = vunpack.c.l.bf16 %v2840_v50 }
 0x1b4   : > { %1977 = vmatprep.subr.bf16.mxu1 %v2480_v41  ;;  %2009 = vmatprep.subr.bf16.mxu0 %v1981_v22  ;;  %v435_v26 = vpop.f32.mrb[11].mxu0  ;;  %v549_v29 = vmul.f32 %v1733_v25, %v2808_v46 }
 0x1b5   : > { %570 = vadd.xlane.f32.xlu0 %v546_v23  ;;  %2011 = vmatpush3.bf16.msra.mxu0 %v1981_v22  ;;  %v1984_v27 = vpack.c.bf16 %v1733_v25, %v435_v26  ;;  %v548_v28 = vmul.f32 %v2808_v46, %v435_v26  ;;  %vm2902_vm12 = vcmp.gt.f32.partialorder %v3256_v19, 0.0 }
 0x1b7   : > { %572 = vadd.xlane.f32.xlu1 %v547_v24  ;;  %2013 = vmatprep.subr.bf16.mxu0 %v1984_v27  ;;  %v1736_v30 = vpop.f32.mrb[12].mxu0 }
 0x1b8   : > { %v445_v31 = vpop.f32.mrb[13].mxu0  ;;  %v551_v34 = vmul.f32 %v1736_v30, %v2808_v46 }
 0x1b9   : > { %574 = vadd.xlane.f32.xlu0 %v548_v28  ;;  %2015 = vmatpush3.bf16.msra.mxu0 %v1984_v27  ;;  %v1987_v32 = vpack.c.bf16 %v1736_v30, %v445_v31  ;;  %v550_v33 = vmul.f32 %v2808_v46, %v445_v31  ;;  %v2879_v31 = vld [vmem:[#allocation4 + $0x18] sm:$0xff]  }
 0x1bb   : > { %1979 = vmatpush3.bf16.xpose.msra.mxu1 %v1978_v17  ;;  %576 = vadd.xlane.f32.xlu1 %v549_v29  ;;  %v1739_v35 = vpop.f32.mrb[14].mxu0 }
 0x1bc   : > { %1980 = vmatprep.subr.bf16.mxu1 %v2480_v41  ;;  %2017 = vmatprep.subr.bf16.mxu0 %v1987_v32  ;;  %v455_v36 = vpop.f32.mrb[15].mxu0  ;;  %v553_v39 = vmul.f32 %v1739_v35, %v2808_v46 }
 0x1bd   : > { %578 = vadd.xlane.f32.xlu0 %v550_v33  ;;  %2019 = vmatpush3.bf16.msra.mxu0 %v1987_v32  ;;  %v1990_v37 = vpack.c.bf16 %v1739_v35, %v455_v36  ;;  %v552_v38 = vmul.f32 %v2808_v46, %v455_v36 }
 0x1bf   : > { %580 = vadd.xlane.f32.xlu1 %v551_v34  ;;  %2021 = vmatprep.subr.bf16.mxu0 %v1990_v37 }
 0x1c1   : > { %582 = vadd.xlane.f32.xlu0 %v552_v38  ;;  %2023 = vmatpush3.bf16.msra.mxu0 %v1990_v37 }
 0x1c3   : > { %1982 = vmatpush3.bf16.xpose.msra.mxu1 %v1981_v22  ;;  %584 = vadd.xlane.f32.xlu1 %v553_v39 }
 0x1c4   : > { %1983 = vmatprep.subr.bf16.mxu1 %v2480_v41 }
 0x1cb   : > { %1985 = vmatpush3.bf16.xpose.msra.mxu1 %v1984_v27 }
 0x1cc   : > { %1986 = vmatprep.subr.bf16.mxu1 %v2480_v41 }
 0x1d3   : > { %1988 = vmatpush3.bf16.xpose.msra.mxu1 %v1987_v32 }
 0x1d4   : > { %1989 = vmatprep.subr.bf16.mxu1 %v2480_v41  ;;  %v1515_v41 = vunpack.c.l.bf16 %v2834_v43 }
 0x1d6   : > { %vm2860_vm2 = vcmp.gt.f32.partialorder %v1515_v41, 0.0 }
 0x1db   : > { %1991 = vmatpush3.bf16.xpose.msra.mxu1 %v1990_v37 }
 0x1e2   : > { %1773 = vmatmul.mubr.f32.vlgmr.msra.gmra.mrb[0].mxu1 %v2784_v16 }
 0x230   : > { %v555_v42 = vpop.xlane.xlu0 %554 }
 0x234   : > { %v559_v40 = vpop.xlane.xlu1 %558  ;;  %v557_v48 = vpop.xlane.xlu0 %556 }
 0x238   : > { %v561_v46 = vpop.xlane.xlu1 %560 }
 0x23a   : > { %v563_v59 = vpop.xlane.xlu0 %562 }
 0x23c   : > { %v565_v54 = vpop.xlane.xlu1 %564 }
 0x23e   : > { %v567_v26 = vpop.xlane.xlu0 %566 }
 0x240   : > { %v569_v23 = vpop.xlane.xlu1 %568 }
 0x244   : > { %v573_v39 = vpop.xlane.xlu1 %572 }
 0x2b5   : > { %v530_v51 = vpop.f32.mrb[0].mxu1 }
 0x2b6   : > { %v2843_v52 = vrot.slane %v530_v51, %v620_v45  ;;  %v1774_v53 = vpop.f32.mrb[1].mxu1  ;;  %v3254_v51 = vunpack.c.l.bf16 %v2879_v31 }
 0x2b7   : > { %v2908_v53 = vld [vmem:[#allocation4 + $0x20] sm:$0xff]  }
 0x2b8   : > { %v623_v60 = vadd.f32 %v2843_v52, %v557_v48  ;;  %v622_v61 = vadd.f32 %v2843_v52, %v555_v42  ;;  %v625_v62 = vadd.f32 %v2843_v52, %v561_v46  ;;  %v624_v63 = vadd.f32 %v2843_v52, %v559_v40  ;;  %v571_v42 = vpop.xlane.xlu0 %570 }
 0x2b9   : > { %v627_v18 = vadd.f32 %v2843_v52, %v565_v54  ;;  %v626_v20 = vadd.f32 %v2843_v52, %v563_v59  ;;  %v629_v35 = vadd.f32 %v2843_v52, %v569_v23  ;;  %v628_v38 = vadd.f32 %v2843_v52, %v567_v26 }
 0x2ba   : > { %vm639_vm3 = vcmp.gt.f32.partialorder %v623_v60, 0.0  ;;  %v655_v21 = vmul.f32 0.2, %v623_v60  ;;  %vm638_vm4 = vcmp.gt.f32.partialorder %v622_v61, 0.0  ;;  %v654_v22 = vmul.f32 0.2, %v622_v61 }
 0x2bb   : > { %vm641_vm5 = vcmp.gt.f32.partialorder %v625_v62, 0.0  ;;  %v657_v24 = vmul.f32 0.2, %v625_v62  ;;  %vm640_vm6 = vcmp.gt.f32.partialorder %v624_v63, 0.0  ;;  %v656_v25 = vmul.f32 0.2, %v624_v63 }
 0x2bc   : > { %v671_v27 = vsel %vm639_vm3, %v623_v60, %v655_v21  ;;  %v670_v28 = vsel %vm638_vm4, %v622_v61, %v654_v22  ;;  %v659_v34 = vmul.f32 0.2, %v627_v18  ;;  %vm643_vm9 = vcmp.gt.f32.partialorder %v627_v18, 0.0  ;;  %v577_v21 = vpop.xlane.xlu1 %576  ;;  %v575_v22 = vpop.xlane.xlu0 %574 }
 0x2bd   : > { %v2883_v32 = vsel %vm2847_vm1, %v671_v27, -1e+30  ;;  %v2887_v33 = vsel %vm2860_vm2, %v670_v28, -1e+30  ;;  %v673_v36 = vsel %vm641_vm5, %v625_v62, %v657_v24  ;;  %v672_v37 = vsel %vm640_vm6, %v624_v63, %v656_v25  ;;  %v2936_v25 = vld [vmem:[#allocation4 + $0x28] sm:$0xff]  }
 0x2be   : > { %720 = vmax.xlane.f32.xlu1 %v2883_v32  ;;  %718 = vmax.xlane.f32.xlu0 %v2887_v33  ;;  %vm642_vm10 = vcmp.gt.f32.partialorder %v626_v20, 0.0  ;;  %v658_v40 = vmul.f32 0.2, %v626_v20  ;;  %v3255_v48 = vunpack.c.h.bf16 %v2879_v31  ;;  %v2912_v54 = vsel %vm2869_vm7, %v673_v36, -1e+30 }
 0x2bf   : > { %v2916_v55 = vsel %vm2875_vm8, %v672_v37, -1e+30  ;;  %v675_v59 = vsel %vm643_vm9, %v627_v18, %v659_v34  ;;  %v661_v60 = vmul.f32 0.2, %v629_v35  ;;  %v660_v62 = vmul.f32 0.2, %v628_v38 }
 0x2c0   : > { %v674_v61 = vsel %vm642_vm10, %v626_v20, %v658_v40  ;;  %v631_v63 = vadd.f32 %v2843_v52, %v573_v39  ;;  %v630_v17 = vadd.f32 %v2843_v52, %v571_v42  ;;  %vm645_vm13 = vcmp.gt.f32.partialorder %v629_v35, 0.0  ;;  %v581_v39 = vpop.xlane.xlu1 %580  ;;  %v579_v42 = vpop.xlane.xlu0 %578 }
 0x2c1   : > { %vm644_vm14 = vcmp.gt.f32.partialorder %v628_v38, 0.0  ;;  %vm2924_vm15 = vcmp.gt.f32.partialorder %v3255_v48, 0.0  ;;  %vm2930_vm0 = vcmp.gt.f32.partialorder %v3254_v51, 0.0  ;;  %v3251_v20 = vunpack.c.h.bf16 %v2908_v53 }
 0x2c2   : > { %724 = vmax.xlane.f32.xlu1 %v2912_v54  ;;  %722 = vmax.xlane.f32.xlu0 %v2916_v55  ;;  %v3250_v24 = vunpack.c.l.bf16 %v2908_v53  ;;  %v2940_v26 = vsel %vm2896_vm11, %v675_v59, -1e+30  ;;  %v2944_v27 = vsel %vm2902_vm12, %v674_v61, -1e+30  ;;  %v633_v28 = vadd.f32 %v2843_v52, %v577_v21 }
 0x2c3   : > { %v632_v29 = vadd.f32 %v2843_v52, %v575_v22  ;;  %v677_v30 = vsel %vm645_vm13, %v629_v35, %v661_v60  ;;  %v676_v34 = vsel %vm644_vm14, %v628_v38, %v660_v62  ;;  %v663_v36 = vmul.f32 0.2, %v631_v63  ;;  %v2964_v38 = vld [vmem:[#allocation4 + $0x30] sm:$0xff]  }
 0x2c4   : > { %v662_v37 = vmul.f32 0.2, %v630_v17  ;;  %vm647_vm1 = vcmp.gt.f32.partialorder %v631_v63, 0.0  ;;  %vm646_vm2 = vcmp.gt.f32.partialorder %v630_v17, 0.0  ;;  %v3253_v40 = vunpack.c.h.bf16 %v2936_v25 }
 0x2c5   : > { %vm2953_vm3 = vcmp.gt.f32.partialorder %v3251_v20, 0.0  ;;  %vm2959_vm4 = vcmp.gt.f32.partialorder %v3250_v24, 0.0  ;;  %v3252_v35 = vunpack.c.l.bf16 %v2936_v25  ;;  %v635_v59 = vadd.f32 %v2843_v52, %v581_v39 }
 0x2c6   : > { %728 = vmax.xlane.f32.xlu1 %v2940_v26  ;;  %726 = vmax.xlane.f32.xlu0 %v2944_v27  ;;  %v2969_v60 = vsel %vm2924_vm15, %v677_v30, -1e+30  ;;  %v2973_v61 = vsel %vm2930_vm0, %v676_v34, -1e+30  ;;  %v665_v62 = vmul.f32 0.2, %v633_v28  ;;  %v634_v21 = vadd.f32 %v2843_v52, %v579_v42  ;;  %v585_v34 = vpop.xlane.xlu1 %584 }
 0x2c7   : > { %v679_v22 = vsel %vm647_vm1, %v631_v63, %v663_v36  ;;  %v678_v24 = vsel %vm646_vm2, %v630_v17, %v662_v37  ;;  %vm649_vm5 = vcmp.gt.f32.partialorder %v633_v28, 0.0  ;;  %v664_v20 = vmul.f32 0.2, %v632_v29  ;;  %v2992_v17 = vld [vmem:[#allocation4 + $0x38] sm:$0xff]   ;;  %v583_v36 = vpop.xlane.xlu0 %582 }
 0x2c8   : > { %vm648_vm6 = vcmp.gt.f32.partialorder %v632_v29, 0.0  ;;  %vm2980_vm7 = vcmp.gt.f32.partialorder %v3253_v40, 0.0  ;;  %vm2986_vm8 = vcmp.gt.f32.partialorder %v3252_v35, 0.0  ;;  %v1540_v30 = vunpack.c.h.bf16 %v2964_v38 }
 0x2c9   : > { %v1539_v63 = vunpack.c.l.bf16 %v2964_v38  ;;  %v2996_v37 = vsel %vm2953_vm3, %v679_v22, -1e+30  ;;  %v3000_v39 = vsel %vm2959_vm4, %v678_v24, -1e+30  ;;  %v681_v42 = vsel %vm649_vm5, %v633_v28, %v665_v62 }
 0x2ca   : > { %732 = vmax.xlane.f32.xlu1 %v2969_v60  ;;  %730 = vmax.xlane.f32.xlu0 %v2973_v61  ;;  %v667_v35 = vmul.f32 0.2, %v635_v59  ;;  %v680_v40 = vsel %vm648_vm6, %v632_v29, %v664_v20  ;;  %v666_v51 = vmul.f32 0.2, %v634_v21  ;;  %v637_v48 = vadd.f32 %v2843_v52, %v585_v34 }
 0x2cb   : > { %v636_v19 = vadd.f32 %v2843_v52, %v583_v36  ;;  %vm651_vm9 = vcmp.gt.f32.partialorder %v635_v59, 0.0  ;;  %vm650_vm10 = vcmp.gt.f32.partialorder %v634_v21, 0.0  ;;  %vm699_vm11 = vcmp.gt.f32.partialorder %v1540_v30, 0.0 }
 0x2cc   : > { %v3258_v24 = vunpack.c.h.bf16 %v2992_v17  ;;  %v3011_v28 = vsel %vm2980_vm7, %v681_v42, -1e+30  ;;  %v3015_v45 = vsel %vm2986_vm8, %v680_v40, -1e+30  ;;  %vm698_vm12 = vcmp.gt.f32.partialorder %v1539_v63, 0.0 }
 0x2cd   : > { %v3257_v52 = vunpack.c.l.bf16 %v2992_v17  ;;  %v683_v20 = vsel %vm651_vm9, %v635_v59, %v667_v35  ;;  %v682_v29 = vsel %vm650_vm10, %v634_v21, %v666_v51  ;;  %v669_v46 = vmul.f32 0.2, %v637_v48 }
 0x2ce   : > { %736 = vmax.xlane.f32.xlu1 %v2996_v37  ;;  %734 = vmax.xlane.f32.xlu0 %v3000_v39  ;;  %v668_v62 = vmul.f32 0.2, %v636_v19  ;;  %vm653_vm13 = vcmp.gt.f32.partialorder %v637_v48, 0.0  ;;  %vm652_vm14 = vcmp.gt.f32.partialorder %v636_v19, 0.0  ;;  %v3022_v22 = vsel %vm699_vm11, %v683_v20, -1e+30 }
 0x2cf   : > { %v3024_v23 = vsel %vm698_vm12, %v682_v29, -1e+30  ;;  %v685_v40 = vsel %vm653_vm13, %v637_v48, %v669_v46  ;;  %vm701_vm15 = vcmp.gt.f32.partialorder %v3258_v24, 0.0  ;;  %vm700_vm0 = vcmp.gt.f32.partialorder %v3257_v52, 0.0 }
 0x2d0   : > { %v684_v18 = vsel %vm652_vm14, %v636_v19, %v668_v62  ;;  %v3032_v51 = vsel %vm701_vm15, %v685_v40, -1e+30 }
 0x2d1   : > { %v3034_v35 = vsel %vm700_vm0, %v684_v18, -1e+30 }
 0x2d2   : > { %740 = vmax.xlane.f32.xlu1 %v3011_v28  ;;  %738 = vmax.xlane.f32.xlu0 %v3015_v45 }
 0x2d6   : > { %744 = vmax.xlane.f32.xlu1 %v3022_v22  ;;  %742 = vmax.xlane.f32.xlu0 %v3024_v23 }
 0x2da   : > { %748 = vmax.xlane.f32.xlu1 %v3032_v51  ;;  %746 = vmax.xlane.f32.xlu0 %v3034_v35 }
 0x34b   : > { %v721_v59 = vpop.xlane.xlu1 %720  ;;  %v719_v21 = vpop.xlane.xlu0 %718 }
 0x34c   : > { %v751_v34 = vsub.f32 %v2883_v32, %v721_v59  ;;  %v750_v48 = vsub.f32 %v2887_v33, %v719_v21 }
 0x34e   : > { %v768_v36 = vmul.f32 1.442695, %v751_v34  ;;  %v766_v42 = vmul.f32 1.442695, %v750_v48 }
 0x34f   : > { %v725_v19 = vpop.xlane.xlu1 %724  ;;  %v723_v20 = vpop.xlane.xlu0 %722 }
 0x350   : > { %2183 = vpow2.f32 %v768_v36  ;;  %v753_v29 = vsub.f32 %v2912_v54, %v725_v19  ;;  %v752_v46 = vsub.f32 %v2916_v55, %v723_v20 }
 0x351   : > { %2185 = vpow2.f32 %v766_v42 }
 0x352   : > { %v772_v62 = vmul.f32 1.442695, %v753_v29  ;;  %v770_v40 = vmul.f32 1.442695, %v752_v46 }
 0x353   : > { %v729_v18 = vpop.xlane.xlu1 %728  ;;  %v727_v52 = vpop.xlane.xlu0 %726 }
 0x354   : > { %2187 = vpow2.f32 %v772_v62  ;;  %v755_v24 = vsub.f32 %v2940_v26, %v729_v18  ;;  %v754_v32 = vsub.f32 %v2944_v27, %v727_v52 }
 0x355   : > { %2189 = vpow2.f32 %v770_v40 }
 0x356   : > { %v776_v33 = vmul.f32 1.442695, %v755_v24  ;;  %v774_v59 = vmul.f32 1.442695, %v754_v32 }
 0x357   : > { %v733_v21 = vpop.xlane.xlu1 %732  ;;  %v731_v34 = vpop.xlane.xlu0 %730 }
 0x358   : > { %2191 = vpow2.f32 %v776_v33  ;;  %v757_v54 = vsub.f32 %v2969_v60, %v733_v21  ;;  %v756_v55 = vsub.f32 %v2973_v61, %v731_v34 }
 0x359   : > { %2193 = vpow2.f32 %v774_v59 }
 0x35a   : > { %v2184_v48 = vpop.eup %2183  ;;  %v780_v36 = vmul.f32 1.442695, %v757_v54  ;;  %v778_v42 = vmul.f32 1.442695, %v756_v55 }
 0x35b   : > { %v2186_v19 = vpop.eup %2185  ;;  %v737_v20 = vpop.xlane.xlu1 %736  ;;  %v799_v26 = vmul.f32 %v2184_v48, %v1516_v47 }
 0x35c   : > { %v735_v29 = vpop.xlane.xlu0 %734  ;;  %2195 = vpow2.f32 %v780_v36  ;;  %v759_v27 = vsub.f32 %v2996_v37, %v737_v20  ;;  %v798_v60 = vmul.f32 %v2186_v19, %v1515_v41 }
 0x35d   : > { %v758_v24 = vsub.f32 %v3000_v39, %v735_v29  ;;  %2197 = vpow2.f32 %v778_v42  ;;  %816 = vadd.xlane.f32.xlu1 %v799_v26 }
 0x35e   : > { %v2188_v61 = vpop.eup %2187  ;;  %v784_v52 = vmul.f32 1.442695, %v759_v27  ;;  %814 = vadd.xlane.f32.xlu0 %v798_v60  ;;  %1807 = vmatprep.mubr.f32.mxu0 %v798_v60 }
 0x35f   : > { %v782_v46 = vmul.f32 1.442695, %v758_v24  ;;  %v2190_v62 = vpop.eup %2189  ;;  %1808 = vmatmul.mubr.f32.vlgmr.msra.gmra.mrb[16].mxu0 %v799_v26  ;;  %v741_v40 = vpop.xlane.xlu1 %740  ;;  %v801_v47 = vmul.f32 %v2188_v61, %v1520_v56  ;;  %v3310_v61 = vunpack.c.h.bf16 %v2908_v53 }
 0x360   : > { %v739_v18 = vpop.xlane.xlu0 %738  ;;  %2199 = vpow2.f32 %v784_v52  ;;  %v761_v37 = vsub.f32 %v3011_v28, %v741_v40  ;;  %v800_v41 = vmul.f32 %v2190_v62, %v1519_v57  ;;  %v3307_v57 = vunpack.c.l.bf16 %v2840_v50 }
 0x361   : > { %v760_v43 = vsub.f32 %v3015_v45, %v739_v18  ;;  %2201 = vpow2.f32 %v782_v46  ;;  %820 = vadd.xlane.f32.xlu1 %v801_v47  ;;  %v3312_v62 = vunpack.c.h.bf16 %v2936_v25  ;;  %v3313_v18 = vunpack.c.l.bf16 %v2936_v25 }
 0x362   : > { %v2192_v39 = vpop.eup %2191  ;;  %v788_v32 = vmul.f32 1.442695, %v761_v37  ;;  %818 = vadd.xlane.f32.xlu0 %v800_v41  ;;  %1810 = vmatprep.mubr.f32.mxu0 %v800_v41  ;;  %v3314_v25 = vunpack.c.h.bf16 %v2992_v17 }
 0x363   : > { %v786_v33 = vmul.f32 1.442695, %v760_v43  ;;  %v2194_v59 = vpop.eup %2193  ;;  %1811 = vmatmul.mubr.f32.gmra.mrb[18].mxu0 %v801_v47  ;;  %v745_v21 = vpop.xlane.xlu1 %744  ;;  %v803_v56 = vmul.f32 %v2192_v39, %v1524_v58  ;;  %v3308_v58 = vunpack.c.h.bf16 %v2879_v31 }
 0x364   : > { %v743_v34 = vpop.xlane.xlu0 %742  ;;  %2203 = vpow2.f32 %v788_v32  ;;  %v763_v28 = vsub.f32 %v3022_v22, %v745_v21  ;;  %v802_v45 = vmul.f32 %v2194_v59, %v3307_v57  ;;  %v3315_v59 = vunpack.c.l.bf16 %v2992_v17 }
 0x365   : > { %v762_v49 = vsub.f32 %v3024_v23, %v743_v34  ;;  %2205 = vpow2.f32 %v786_v33  ;;  %824 = vadd.xlane.f32.xlu1 %v803_v56  ;;  %v3309_v23 = vunpack.c.l.bf16 %v2879_v31 }
 0x366   : > { %v2196_v54 = vpop.eup %2195  ;;  %v792_v55 = vmul.f32 1.442695, %v763_v28  ;;  %822 = vadd.xlane.f32.xlu0 %v802_v45  ;;  %1813 = vmatprep.mubr.f32.mxu0 %v802_v45 }
 0x367   : > { %v790_v48 = vmul.f32 1.442695, %v762_v49  ;;  %v2198_v36 = vpop.eup %2197  ;;  %1814 = vmatmul.mubr.f32.gmra.mrb[20].mxu0 %v803_v56  ;;  %v749_v42 = vpop.xlane.xlu1 %748  ;;  %v805_v20 = vmul.f32 %v2196_v54, %v3308_v58  ;;  %v1057_v58 = vsub.s32 2, %v2804_v44 }
 0x368   : > { %v747_v19 = vpop.xlane.xlu0 %746  ;;  %2207 = vpow2.f32 %v792_v55  ;;  %v765_v22 = vsub.f32 %v3032_v51, %v749_v42  ;;  %v804_v29 = vmul.f32 %v2198_v36, %v3309_v23  ;;  %v3311_v51 = vunpack.c.l.bf16 %v2908_v53 }
 0x369   : > { %v764_v50 = vsub.f32 %v3034_v35, %v747_v19  ;;  %2209 = vpow2.f32 %v790_v48  ;;  %828 = vadd.xlane.f32.xlu1 %v805_v20  ;;  %v3088_v23 = vrot.slane %v2784_v16, %v1057_v58 }
 0x36a   : > { %v2200_v26 = vpop.eup %2199  ;;  %v796_v27 = vmul.f32 1.442695, %v765_v22  ;;  %826 = vadd.xlane.f32.xlu0 %v804_v29  ;;  %1816 = vmatprep.mubr.f32.mxu0 %v804_v29 }
 0x36b   : > { %v794_v24 = vmul.f32 1.442695, %v764_v50  ;;  %v2202_v60 = vpop.eup %2201  ;;  %1817 = vmatmul.mubr.f32.gmra.mrb[22].mxu0 %v805_v20  ;;  %v807_v52 = vmul.f32 %v2200_v26, %v3310_v61 }
 0x36c   : > { %2211 = vpow2.f32 %v796_v27  ;;  %v806_v46 = vmul.f32 %v2202_v60, %v3311_v51 }
 0x36d   : > { %2213 = vpow2.f32 %v794_v24  ;;  %832 = vadd.xlane.f32.xlu1 %v807_v52 }
 0x36e   : > { %v2204_v31 = vpop.eup %2203  ;;  %830 = vadd.xlane.f32.xlu0 %v806_v46  ;;  %1819 = vmatprep.mubr.f32.mxu0 %v806_v46 }
 0x36f   : > { %v2206_v35 = vpop.eup %2205  ;;  %1820 = vmatmul.mubr.f32.gmra.mrb[24].mxu0 %v807_v52  ;;  %v809_v40 = vmul.f32 %v2204_v31, %v3312_v62 }
 0x370   : > { %v808_v47 = vmul.f32 %v2206_v35, %v3313_v18 }
 0x371   : > { %836 = vadd.xlane.f32.xlu1 %v809_v40 }
 0x372   : > { %v2208_v37 = vpop.eup %2207  ;;  %834 = vadd.xlane.f32.xlu0 %v808_v47  ;;  %1822 = vmatprep.mubr.f32.mxu0 %v808_v47 }
 0x373   : > { %v2210_v43 = vpop.eup %2209  ;;  %1823 = vmatmul.mubr.f32.gmra.mrb[26].mxu0 %v809_v40  ;;  %v811_v53 = vmul.f32 %v2208_v37, %v1540_v30 }
 0x374   : > { %v810_v41 = vmul.f32 %v2210_v43, %v1539_v63 }
 0x375   : > { %840 = vadd.xlane.f32.xlu1 %v811_v53 }
 0x376   : > { %v2212_v39 = vpop.eup %2211  ;;  %838 = vadd.xlane.f32.xlu0 %v810_v41  ;;  %1825 = vmatprep.mubr.f32.mxu0 %v810_v41 }
 0x377   : > { %v2214_v32 = vpop.eup %2213  ;;  %1826 = vmatmul.mubr.f32.gmra.mrb[28].mxu0 %v811_v53  ;;  %v813_v33 = vmul.f32 %v2212_v39, %v3314_v25 }
 0x378   : > { %v812_v21 = vmul.f32 %v2214_v32, %v3315_v59 }
 0x379   : > { %844 = vadd.xlane.f32.xlu1 %v813_v33 }
 0x37a   : > { %842 = vadd.xlane.f32.xlu0 %v812_v21  ;;  %1828 = vmatprep.mubr.f32.mxu0 %v812_v21 }
 0x37b   : > { %1829 = vmatmul.mubr.f32.gmra.mrb[30].mxu0 %v813_v33 }
 0x3ea   : > { %v817_v30 = vpop.xlane.xlu1 %816 }
 0x3eb   : > { %v815_v34 = vpop.xlane.xlu0 %814  ;;  %v847_v49 = vmax.f32 %v817_v30, 1e-30 }
 0x3ec   : > { %v846_v57 = vmax.f32 %v815_v34, 1e-30 }
 0x3ed   : > { %2215 = vrcp.f32 %v847_v49 }
 0x3ee   : > { %v821_v38 = vpop.xlane.xlu1 %820  ;;  %2217 = vrcp.f32 %v846_v57 }
 0x3ef   : > { %v819_v63 = vpop.xlane.xlu0 %818  ;;  %v849_v55 = vmax.f32 %v821_v38, 1e-30 }
 0x3f0   : > { %v848_v48 = vmax.f32 %v819_v63, 1e-30 }
 0x3f1   : > { %2219 = vrcp.f32 %v849_v55 }
 0x3f2   : > { %v825_v56 = vpop.xlane.xlu1 %824  ;;  %2221 = vrcp.f32 %v848_v48 }
 0x3f3   : > { %v823_v28 = vpop.xlane.xlu0 %822  ;;  %v851_v36 = vmax.f32 %v825_v56, 1e-30 }
 0x3f4   : > { %v850_v19 = vmax.f32 %v823_v28, 1e-30 }
 0x3f5   : > { %2223 = vrcp.f32 %v851_v36 }
 0x3f6   : > { %v829_v45 = vpop.xlane.xlu1 %828  ;;  %2225 = vrcp.f32 %v850_v19 }
 0x3f7   : > { %v827_v54 = vpop.xlane.xlu0 %826  ;;  %v853_v20 = vmax.f32 %v829_v45, 1e-30  ;;  %v2216_v29 = vpop.eup %2215 }
 0x3f8   : > { %v852_v22 = vmax.f32 %v827_v54, 1e-30  ;;  %v2218_v24 = vpop.eup %2217 }
 0x3f9   : > { %2227 = vrcp.f32 %v853_v20 }
 0x3fa   : > { %v833_v17 = vpop.xlane.xlu1 %832  ;;  %2229 = vrcp.f32 %v852_v22 }
 0x3fb   : > { %v831_v42 = vpop.xlane.xlu0 %830  ;;  %v855_v52 = vmax.f32 %v833_v17, 1e-30  ;;  %v2220_v31 = vpop.eup %2219 }
 0x3fc   : > { %v854_v46 = vmax.f32 %v831_v42, 1e-30  ;;  %v2222_v40 = vpop.eup %2221 }
 0x3fd   : > { %2231 = vrcp.f32 %v855_v52 }
 0x3fe   : > { %v837_v50 = vpop.xlane.xlu1 %836  ;;  %2233 = vrcp.f32 %v854_v46 }
 0x3ff   : > { %v835_v26 = vpop.xlane.xlu0 %834  ;;  %v857_v43 = vmax.f32 %v837_v50, 1e-30  ;;  %v2224_v25 = vpop.eup %2223 }
 0x400   : > { %v856_v39 = vmax.f32 %v835_v26, 1e-30  ;;  %v2226_v21 = vpop.eup %2225 }
 0x401   : > { %2235 = vrcp.f32 %v857_v43 }
 0x402   : > { %v841_v18 = vpop.xlane.xlu1 %840  ;;  %2237 = vrcp.f32 %v856_v39 }
 0x403   : > { %v839_v53 = vpop.xlane.xlu0 %838  ;;  %v859_v38 = vmax.f32 %v841_v18, 1e-30  ;;  %v2228_v57 = vpop.eup %2227 }
 0x404   : > { %v858_v56 = vmax.f32 %v839_v53, 1e-30  ;;  %v2230_v48 = vpop.eup %2229 }
 0x405   : > { %2239 = vrcp.f32 %v859_v38 }
 0x406   : > { %v845_v28 = vpop.xlane.xlu1 %844  ;;  %2241 = vrcp.f32 %v858_v56 }
 0x407   : > { %v843_v45 = vpop.xlane.xlu0 %842  ;;  %v861_v42 = vmax.f32 %v845_v28, 1e-30  ;;  %v2232_v22 = vpop.eup %2231 }
 0x408   : > { %v860_v58 = vmax.f32 %v843_v45, 1e-30  ;;  %v2234_v26 = vpop.eup %2233 }
 0x409   : > { %2243 = vrcp.f32 %v861_v42 }
 0x40a   : > { %2245 = vrcp.f32 %v860_v58 }
 0x40b   : > { %v2236_v52 = vpop.eup %2235 }
 0x432   : > { %v1809_v27 = vpop.f32.mrb[16].mxu0 }
 0x433   : > { %v1040_v60 = vmul.f32 %v2216_v29, %v1809_v27  ;;  %v960_v61 = vpop.f32.mrb[17].mxu0 }
 0x434   : > { %v1039_v51 = vmul.f32 %v2218_v24, %v960_v61 }
 0x435   : > { %v3091_v44 = vadd.f32 %v3088_v23, %v1040_v60 }
 0x436   : > { %v3094_v35 = vadd.f32 %v3088_v23, %v1039_v51  ;;  %v1812_v62 = vpop.f32.mrb[18].mxu0 }
 0x437   : > { %v1042_v47 = vmul.f32 %v2220_v31, %v1812_v62  ;;  %v970_v37 = vpop.f32.mrb[19].mxu0  ;;  %v2238_v31 = vpop.eup %2237 }
 0x438   : > { %v1041_v41 = vmul.f32 %v2222_v40, %v970_v37  ;;  %v2240_v37 = vpop.eup %2239 }
 0x439   : > { %v3097_v32 = vadd.f32 %v3088_v23, %v1042_v47 }
 0x43a   : > { %v3100_v33 = vadd.f32 %v3088_v23, %v1041_v41  ;;  %v1815_v59 = vpop.f32.mrb[20].mxu0  ;;  %v2242_v41 = vpop.eup %2241 }
 0x43b   : > { %v1044_v30 = vmul.f32 %v2224_v25, %v1815_v59  ;;  %v980_v34 = vpop.f32.mrb[21].mxu0  ;;  %v1082_v42 = vmax.f32 (!%p1504_p1), %v3097_v32, 0.0 }
 0x43c   : > { %v1043_v63 = vmul.f32 %v2226_v21, %v980_v34 }
 0x43d   : > { %v3103_v49 = vadd.f32 %v3088_v23, %v1044_v30  ;;  %v2244_v30 = vpop.eup %2243  ;;  %1098 = vst [vmem:[#allocation2 + $0x18] sm:$0xff] (!%p1504_p1), %v1082_v42 }
 0x43e   : > { %v3106_v54 = vadd.f32 %v3088_v23, %v1043_v63  ;;  %v1818_v55 = vpop.f32.mrb[22].mxu0  ;;  %v2246_v63 = vpop.eup %2245 }
 0x43f   : > { %v1046_v17 = vmul.f32 %v2228_v57, %v1818_v55  ;;  %v990_v36 = vpop.f32.mrb[23].mxu0  ;;  %v1084_v58 = vmax.f32 (!%p1504_p1), %v3103_v49, 0.0 }
 0x440   : > { %v1045_v19 = vmul.f32 %v2230_v48, %v990_v36  ;;  %v1079_v48 = vmax.f32 (!%p1504_p1), %v3094_v35, 0.0  ;;  %v1081_v36 = vmax.f32 (!%p1504_p1), %v3100_v33, 0.0 }
 0x441   : > { %v3109_v20 = vadd.f32 %v3088_v23, %v1046_v17  ;;  %v1080_v17 = vmax.f32 (!%p1504_p1), %v3091_v44, 0.0  ;;  %1100 = vst [vmem:[#allocation2 + $0x28] sm:$0xff] (!%p1504_p1), %v1084_v58 }
 0x442   : > { %v3112_v50 = vadd.f32 %v3088_v23, %v1045_v19  ;;  %v1821_v29 = vpop.f32.mrb[24].mxu0  ;;  %v1083_v19 = vmax.f32 (!%p1504_p1), %v3106_v54, 0.0  ;;  %1095 = vst [vmem:[#allocation2] sm:$0xff] (!%p1504_p1), %v1079_v48  ;;  %1097 = vst [vmem:[#allocation2 + $0x10] sm:$0xff] (!%p1504_p1), %v1081_v36 }
 0x443   : > { %v1048_v27 = vmul.f32 %v2232_v22, %v1821_v29  ;;  %v1000_v24 = vpop.f32.mrb[25].mxu0  ;;  %v1086_v29 = vmax.f32 (!%p1504_p1), %v3109_v20, 0.0  ;;  %1096 = vst [vmem:[#allocation2 + $0x8] sm:$0xff] (!%p1504_p1), %v1080_v17 }
 0x444   : > { %v1047_v60 = vmul.f32 %v2234_v26, %v1000_v24  ;;  %v1085_v22 = vmax.f32 (!%p1504_p1), %v3112_v50, 0.0  ;;  %1099 = vst [vmem:[#allocation2 + $0x20] sm:$0xff] (!%p1504_p1), %v1083_v19 }
 0x445   : > { %v3115_v61 = vadd.f32 %v3088_v23, %v1048_v27  ;;  %1102 = vst [vmem:[#allocation2 + $0x38] sm:$0xff] (!%p1504_p1), %v1086_v29 }
 0x446   : > { %v3118_v51 = vadd.f32 %v3088_v23, %v1047_v60  ;;  %v1824_v46 = vpop.f32.mrb[26].mxu0  ;;  %1101 = vst [vmem:[#allocation2 + $0x30] sm:$0xff] (!%p1504_p1), %v1085_v22 }
 0x447   : > { %v1050_v62 = vmul.f32 %v2236_v52, %v1824_v46  ;;  %v1010_v40 = vpop.f32.mrb[27].mxu0  ;;  %v1088_v26 = vmax.f32 (!%p1504_p1), %v3115_v61, 0.0 }
 0x448   : > { %v1049_v18 = vmul.f32 %v2238_v31, %v1010_v40 }
 0x449   : > { %v3121_v47 = vadd.f32 %v3088_v23, %v1050_v62  ;;  %1104 = vst [vmem:[#allocation2 + $0x48] sm:$0xff] (!%p1504_p1), %v1088_v26 }
 0x44a   : > { %v1069_v43 = vadd.f32 %v3088_v23, %v1049_v18  ;;  %v1827_v53 = vpop.f32.mrb[28].mxu0 }
 0x44b   : > { %v1052_v39 = vmul.f32 %v2240_v37, %v1827_v53  ;;  %v1020_v25 = vpop.f32.mrb[29].mxu0  ;;  %v1090_v24 = vmax.f32 (!%p1504_p1), %v3121_v47, 0.0 }
 0x44c   : > { %v1051_v59 = vmul.f32 %v2242_v41, %v1020_v25  ;;  %1078 = sbr.rel (%p1504_p1) target bundleno = 1111 (0x457), region = 68  ;;  %v1089_v27 = vmax.f32 (!%p1504_p1), %v1069_v43, 0.0 }
 0x44d   : > { %v1072_v21 = vadd.f32 %v3088_v23, %v1052_v39  ;;  %1106 = vst [vmem:[#allocation2 + $0x58] sm:$0xff] (!%p1504_p1), %v1090_v24 }
 0x44e   : > { %v1071_v34 = vadd.f32 %v3088_v23, %v1051_v59  ;;  %v1830_v38 = vpop.f32.mrb[30].mxu0  ;;  %1105 = vst [vmem:[#allocation2 + $0x50] sm:$0xff] (!%p1504_p1), %v1089_v27 }
 0x44f   : > { %v1054_v56 = vmul.f32 %v2244_v30, %v1830_v38  ;;  %v1030_v28 = vpop.f32.mrb[31].mxu0  ;;  %v1092_v52 = vmax.f32 (!%p1504_p1), %v1072_v21, 0.0 }
 0x450   : > { %v1053_v57 = vmul.f32 %v2246_v63, %v1030_v28  ;;  %v1091_v60 = vmax.f32 (!%p1504_p1), %v1071_v34, 0.0 }
 0x451   : > { %v1074_v45 = vadd.f32 %v3088_v23, %v1054_v56  ;;  %1108 = vst [vmem:[#allocation2 + $0x68] sm:$0xff] (!%p1504_p1), %v1092_v52 }
 0x452   : > { %v1073_v55 = vadd.f32 %v3088_v23, %v1053_v57  ;;  %v1087_v23 = vmax.f32 (!%p1504_p1), %v3118_v51, 0.0  ;;  %1107 = vst [vmem:[#allocation2 + $0x60] sm:$0xff] (!%p1504_p1), %v1091_v60 }
 0x453   : > { %v1094_v31 = vmax.f32 %v1074_v45, 0.0 }
 0x454   : > { %v1093_v46 = vmax.f32 %v1073_v55, 0.0  ;;  %1103 = vst [vmem:[#allocation2 + $0x40] sm:$0xff] %v1087_v23 }
 0x455   : > { %1110 = vst [vmem:[#allocation2 + $0x78] sm:$0xff] %v1094_v31 }
 0x456   : > { %1109 = vst [vmem:[#allocation2 + $0x70] sm:$0xff] %v1093_v46 }
 0x457 PF: > { %p1505_p6 = scmp.ne.s32.totalorder %s2536_s22, 1 }
 0x458   : > { %1115 = vst [vmem:[#allocation2] sm:$0xff] (!%p1505_p6), %v3094_v35  ;;  %1116 = vst [vmem:[#allocation2 + $0x8] sm:$0xff] (!%p1505_p6), %v3091_v44 }
 0x459   : > { %1114 = sbr.rel (%p1505_p6) target bundleno = 1120 (0x460), region = 72  ;;  %1117 = vst [vmem:[#allocation2 + $0x10] sm:$0xff] (!%p1505_p6), %v3100_v33  ;;  %1118 = vst [vmem:[#allocation2 + $0x18] sm:$0xff] (!%p1505_p6), %v3097_v32 }
 0x45a   : > { %1119 = vst [vmem:[#allocation2 + $0x20] sm:$0xff] (!%p1505_p6), %v3106_v54  ;;  %1120 = vst [vmem:[#allocation2 + $0x28] sm:$0xff] (!%p1505_p6), %v3103_v49 }
 0x45b   : > { %1121 = vst [vmem:[#allocation2 + $0x30] sm:$0xff] (!%p1505_p6), %v3112_v50  ;;  %1122 = vst [vmem:[#allocation2 + $0x38] sm:$0xff] (!%p1505_p6), %v3109_v20 }
 0x45c   : > { %1123 = vst [vmem:[#allocation2 + $0x40] sm:$0xff] (!%p1505_p6), %v3118_v51  ;;  %1124 = vst [vmem:[#allocation2 + $0x48] sm:$0xff] (!%p1505_p6), %v3115_v61 }
 0x45d   : > { %1125 = vst [vmem:[#allocation2 + $0x50] sm:$0xff] (!%p1505_p6), %v1069_v43  ;;  %1126 = vst [vmem:[#allocation2 + $0x58] sm:$0xff] (!%p1505_p6), %v3121_v47 }
 0x45e   : > { %1127 = vst [vmem:[#allocation2 + $0x60] sm:$0xff] (!%p1505_p6), %v1071_v34  ;;  %1128 = vst [vmem:[#allocation2 + $0x68] sm:$0xff] (!%p1505_p6), %v1072_v21 }
 0x45f   : > { %1129 = vst [vmem:[#allocation2 + $0x70] sm:$0xff] (!%p1505_p6), %v1073_v55  ;;  %1130 = vst [vmem:[#allocation2 + $0x78] sm:$0xff] (!%p1505_p6), %v1074_v45 }
 0x460 PF: > { %p1506_p10 = scmp.ne.s32.totalorder %s2536_s22, 2 }
 0x461   : > { %v1135_v44 = vld [vmem:[#allocation2] sm:$0xff] (!%p1506_p10)  ;;  %v1136_v35 = vld [vmem:[#allocation2 + $0x8] sm:$0xff] (!%p1506_p10)  ;;  %v2483_v32 = vmov (!%p1506_p10), 0.0|0.0   ;;  %vm2484_vm1 = vmmov (!%p1506_p10), 0   ;;  %v2485_v49 = vmov (!%p1506_p10), 0.0   ;;  %v1137_v54 = vld [vmem:[#allocation2 + $0x10] sm:$0xff] (!%p1506_p10)  ;;  %v1223_v56 = vlaneseq (!%p1506_p10) }
 0x462   : > { %1134 = sbr.rel (%p1506_p10) target bundleno = 1990 (0x7c6), region = 76  ;;  %2024 = vmatprep.subr.bf16.mxu0 (!%p1506_p10), %v2483_v32  ;;  %v2025_v33 = vpack.c.bf16 (!%p1506_p10), %v1136_v35, %v1135_v44  ;;  %1863 = vmatprep.mubr.msk.f32.mxu0 (!%p1506_p10), %vm2484_vm1, %v2485_v49  ;;  %v1138_v20 = vld [vmem:[#allocation2 + $0x18] sm:$0xff] (!%p1506_p10)  ;;  %v1139_v61 = vld [vmem:[#allocation2 + $0x20] sm:$0xff] (!%p1506_p10)  ;;  %v1140_v51 = vld [vmem:[#allocation2 + $0x28] sm:$0xff] (!%p1506_p10)  ;;  %v2073_v23 = vpack.c.bf16 (!%p1506_p10), %v2740_v1, %v2737_v0  ;;  %v2076_v26 = vpack.c.bf16 (!%p1506_p10), %v2746_v3, %v2743_v2 }
 0x463   : > { %2048 = vmatprep.subr.bf16.mxu1 (!%p1506_p10), %v2483_v32  ;;  %1898 = vmatprep.mubr.msk.f32.mxu1 (!%p1506_p10), %vm2484_vm1, %v2485_v49  ;;  %v2028_v50 = vpack.c.bf16 (!%p1506_p10), %v1138_v20, %v1137_v54  ;;  %v2031_v62 = vpack.c.bf16 (!%p1506_p10), %v1140_v51, %v1139_v61  ;;  %v1141_v40 = vld [vmem:[#allocation2 + $0x30] sm:$0xff] (!%p1506_p10)  ;;  %v1142_v18 = vld [vmem:[#allocation2 + $0x38] sm:$0xff] (!%p1506_p10)  ;;  %v1143_v37 = vld [vmem:[#allocation2 + $0x40] sm:$0xff] (!%p1506_p10)  ;;  %v1224_v28 = vshrl.u32 (!%p1506_p10), %v1223_v56, 7  ;;  %v2079_v27 = vpack.c.bf16 (!%p1506_p10), %v2752_v5, %v2749_v4 }
 0x464   : > { %2026 = vmatpush3.bf16.xpose.msra.mxu0 (!%p1506_p10), %v2025_v33  ;;  %2050 = vmatpush3.bf16.msra.mxu1 (!%p1506_p10), %v2025_v33  ;;  %v2034_v47 = vpack.c.bf16 (!%p1506_p10), %v1142_v18, %v1141_v40  ;;  %v1144_v43 = vld [vmem:[#allocation2 + $0x48] sm:$0xff] (!%p1506_p10)  ;;  %v1145_v41 = vld [vmem:[#allocation2 + $0x50] sm:$0xff] (!%p1506_p10)  ;;  %v1146_v39 = vld [vmem:[#allocation2 + $0x58] sm:$0xff] (!%p1506_p10)  ;;  %v2082_v24 = vpack.c.bf16 (!%p1506_p10), %v2758_v7, %v2755_v6  ;;  %v2085_v0 = vpack.c.bf16 (!%p1506_p10), %v2764_v9, %v2761_v8 }
 0x465   : > { %2027 = vmatprep.subr.bf16.mxu0 (!%p1506_p10), %v2483_v32  ;;  %2051 = vmatprep.subr.bf16.mxu1 (!%p1506_p10), %v2483_v32  ;;  %v2037_v53 = vpack.c.bf16 (!%p1506_p10), %v1144_v43, %v1143_v37  ;;  %v2040_v25 = vpack.c.bf16 (!%p1506_p10), %v1146_v39, %v1145_v41  ;;  %v1147_v59 = vld [vmem:[#allocation2 + $0x60] sm:$0xff] (!%p1506_p10)  ;;  %v1148_v21 = vld [vmem:[#allocation2 + $0x68] sm:$0xff] (!%p1506_p10)  ;;  %v1225_v57 = vsub.s32 (!%p1506_p10), 0, %v1224_v28  ;;  %v2088_v1 = vpack.c.bf16 (!%p1506_p10), %v2770_v11, %v2767_v10 }
 0x466   : > { %v2043_v30 = vpack.c.bf16 (!%p1506_p10), %v1148_v21, %v1147_v59  ;;  %v1149_v34 = vld [vmem:[#allocation2 + $0x70] sm:$0xff] (!%p1506_p10)  ;;  %v1150_v38 = vld [vmem:[#allocation2 + $0x78] sm:$0xff] (!%p1506_p10)  ;;  %v1151_v45 = vld [vmem:[#allocation7] sm:$0xff] (!%p1506_p10)  ;;  %v2091_v2 = vpack.c.bf16 (!%p1506_p10), %v2776_v13, %v2773_v12  ;;  %v2094_v3 = vpack.c.bf16 (!%p1506_p10), %v2782_v15, %v2779_v14  ;;  %v1312_v10 = vsub.s32 (!%p1506_p10), 1, %v1224_v28 }
 0x467   : > { %v2046_v63 = vpack.c.bf16 (!%p1506_p10), %v1150_v38, %v1149_v34  ;;  %vm1222_vm2 = vcmp.gt.f32.partialorder (!%p1506_p10), %v1151_v45, 0.0 }
 0x468   : > { %2053 = vmatpush3.bf16.msra.mxu1 (!%p1506_p10), %v2028_v50  ;;  %v1313_v11 = vrot.slane (!%p1506_p10), %v2784_v16, %v1312_v10 }
 0x469   : > { %2054 = vmatprep.subr.bf16.mxu1 %v2483_v32 }
 0x46c   : > { %2029 = vmatpush3.bf16.xpose.msra.mxu0 %v2028_v50  ;;  %2056 = vmatpush3.bf16.msra.mxu1 %v2031_v62 }
 0x46d   : > { %2030 = vmatprep.subr.bf16.mxu0 %v2483_v32  ;;  %2057 = vmatprep.subr.bf16.mxu1 %v2483_v32 }
 0x470   : > { %2059 = vmatpush3.bf16.msra.mxu1 %v2034_v47 }
 0x471   : > { %2060 = vmatprep.subr.bf16.mxu1 %v2483_v32 }
 0x474   : > { %2032 = vmatpush3.bf16.xpose.msra.mxu0 %v2031_v62  ;;  %2062 = vmatpush3.bf16.msra.mxu1 %v2037_v53 }
 0x475   : > { %2033 = vmatprep.subr.bf16.mxu0 %v2483_v32  ;;  %2063 = vmatprep.subr.bf16.mxu1 %v2483_v32 }
 0x478   : > { %2065 = vmatpush3.bf16.msra.mxu1 %v2040_v25 }
 0x479   : > { %2066 = vmatprep.subr.bf16.mxu1 %v2483_v32 }
 0x47c   : > { %2035 = vmatpush3.bf16.xpose.msra.mxu0 %v2034_v47  ;;  %2068 = vmatpush3.bf16.msra.mxu1 %v2043_v30 }
 0x47d   : > { %2036 = vmatprep.subr.bf16.mxu0 %v2483_v32  ;;  %2069 = vmatprep.subr.bf16.mxu1 %v2483_v32 }
 0x480   : > { %2071 = vmatpush3.bf16.msra.mxu1 %v2046_v63 }
 0x481   : > { %2072 = vmatprep.subr.bf16.mxu1 %v2483_v32 }
 0x484   : > { %2038 = vmatpush3.bf16.xpose.msra.mxu0 %v2037_v53 }
 0x485   : > { %2039 = vmatprep.subr.bf16.mxu0 %v2483_v32 }
 0x48c   : > { %2041 = vmatpush3.bf16.xpose.msra.mxu0 %v2040_v25 }
 0x48d   : > { %2042 = vmatprep.subr.bf16.mxu0 %v2483_v32 }
 0x494   : > { %2044 = vmatpush3.bf16.xpose.msra.mxu0 %v2043_v30 }
 0x495   : > { %2045 = vmatprep.subr.bf16.mxu0 %v2483_v32 }
 0x49c   : > { %2047 = vmatpush3.bf16.xpose.msra.mxu0 %v2046_v63 }
 0x4a3   : > { %1864 = vmatmul.mubr.f32.vlgmr.msra.gmra.mrb[0].mxu0 %v2784_v16 }
 0x576   : > { %v1218_v55 = vpop.f32.mrb[0].mxu0 }
 0x577   : > { %v1226_v48 = vrot.slane %v1218_v55, %v1225_v57  ;;  %v1865_v17 = vpop.f32.mrb[1].mxu0 }
 0x579   : > { %v1227_v36 = vsel %vm1222_vm2, %v1226_v48, -1e+30 }
 0x57a   : > { %1228 = vmax.xlane.f32.xlu0 %v1227_v36 }
 0x607   : > { %v1229_v42 = vpop.xlane.xlu0 %1228 }
 0x608   : > { %v1230_v19 = vsub.f32 %v1227_v36, %v1229_v42 }
 0x60a   : > { %v1231_v58 = vmul.f32 1.442695, %v1230_v19 }
 0x60c   : > { %2247 = vpow2.f32 %v1231_v58 }
 0x616   : > { %v2248_v22 = vpop.eup %2247 }
 0x617   : > { %v1233_v29 = vmul.f32 %v2248_v22, %v1151_v45 }
 0x619   : > { %1234 = vadd.xlane.f32.xlu0 %v1233_v29  ;;  %1899 = vmatmul.mubr.f32.vlgmr.msra.gmra.mrb[0].mxu1 %v1233_v29 }
 0x61a   : > { %1933 = vmatprep.mubr.msk.f32.mxu1 %vm2484_vm1, %v2485_v49  ;;  %2074 = vmatpush3.bf16.msra.mxu1 %v2073_v23 }
 0x61b   : > { %2075 = vmatprep.subr.bf16.mxu1 %v2483_v32 }
 0x61e   : > { %2077 = vmatpush3.bf16.msra.mxu1 %v2076_v26 }
 0x61f   : > { %2078 = vmatprep.subr.bf16.mxu1 %v2483_v32 }
 0x622   : > { %2080 = vmatpush3.bf16.msra.mxu1 %v2079_v27 }
 0x623   : > { %2081 = vmatprep.subr.bf16.mxu1 %v2483_v32 }
 0x626   : > { %2083 = vmatpush3.bf16.msra.mxu1 %v2082_v24 }
 0x627   : > { %2084 = vmatprep.subr.bf16.mxu1 %v2483_v32 }
 0x62a   : > { %2086 = vmatpush3.bf16.msra.mxu1 %v2085_v0 }
 0x62b   : > { %2087 = vmatprep.subr.bf16.mxu1 %v2483_v32 }
 0x62e   : > { %2089 = vmatpush3.bf16.msra.mxu1 %v2088_v1 }
 0x62f   : > { %2090 = vmatprep.subr.bf16.mxu1 %v2483_v32 }
 0x632   : > { %2092 = vmatpush3.bf16.msra.mxu1 %v2091_v2 }
 0x633   : > { %2093 = vmatprep.subr.bf16.mxu1 %v2483_v32 }
 0x636   : > { %2095 = vmatpush3.bf16.msra.mxu1 %v2094_v3 }
 0x6a6   : > { %v1235_v4 = vpop.xlane.xlu0 %1234 }
 0x6a7   : > { %v1236_v5 = vmax.f32 %v1235_v4, 1e-30 }
 0x6a9   : > { %2249 = vrcp.f32 %v1236_v5 }
 0x6b3   : > { %v2250_v6 = vpop.eup %2249 }
 0x6ec   : > { %v1305_v7 = vpop.f32.mrb[0].mxu1 }
 0x6ed   : > { %v1309_v8 = vmul.f32 %v2250_v6, %v1305_v7  ;;  %v1900_v9 = vpop.f32.mrb[1].mxu1 }
 0x6ef   : > { %1934 = vmatmul.mubr.f32.vlgmr.msra.gmra.mrb[2].mxu1 %v1309_v8 }
 0x7c2   : > { %v1380_v12 = vpop.f32.mrb[2].mxu1 }
 0x7c3   : > { %v1381_v13 = vadd.f32 %v1380_v12, %v1313_v11  ;;  %v1935_v60 = vpop.f32.mrb[3].mxu1 }
 0x7c5   : > { %1384 = vst [vmem:[#allocation11] sm:$0xff] %v1381_v13 }
 0x7c6 PF: > { %p2135_p11 = scmp.eq.s32.totalorder %s2536_s22, 2  ;;  %s2486_s15 = smov [#allocation11]  }
 0x7c7   : > { %s1392_s9 = sshll.u32 %s2486_s15, 4  ;;  %s1393_s9 = int_to_ptr.vmem [resolvable:$true] %s1392_s9 }
 0x7c8   : > { %s2393_s10 = scalar_lea.vmem %s1393_s9, 128  ;;  %p2400_p13 = scmp.lt.s32.totalorder %s1393_s9, %s1393_s9 }
 0x7c9   : > { %p2394_p7 = scmp.ne.s32.totalorder %s1393_s9, %s2393_s10  ;;  %p2401_p2 = scmp.lt.s32.totalorder %s2393_s10, %s2393_s10 }
 0x7cb   : > { %p2395_p12 = pnand %p2394_p7, %p2135_p11  ;;  %p2402_p9 = por %p2401_p2, %p2400_p13 }
 0x7cd   : > { %p2396_p5 = pneg %p2395_p12 }
 0x7cf   : > { %p2403_p3 = pnand %p2402_p9, %p2396_p5 }
 0x7d1   : > { %2406 = shalt.err (!%p2403_p3)
}
 0x7d2   : > { %s2407_s29 = scalar_lea.hbm %s3242_s5, 128 }
 0x7d3   : > { %p2408_p4 = scmp.ne.s32.totalorder %s3242_s5, %s2407_s29  ;;  %p2413_p1 = scmp.lt.u32.totalorder %s2407_s29, %s3242_s5 }
 0x7d5   : > { %p2409_p0 = pnand %p2408_p4, %p2135_p11 }
 0x7d7   : > { %p2410_p8 = pneg %p2409_p0 }
 0x7d9   : > { %p2415_p6 = pnand %p2413_p1, %p2410_p8 }
 0x7db   : > { %2418 = shalt.err (!%p2415_p6)
}
 0x7dc   : > { %2112 = dma.vmem_to_hbm [thread:$0]  (%p2135_p11), %s1393_s9, 128, %s3242_s5, [#allocation6]  }
 0x7dd   : > { %2452 = dma.done.wait (%p2135_p11), [#allocation6], 128  }
 0x7de   : > { %2454 = vsyncadd (%p2135_p11), [#allocation6], 4294967168 }
 0x7df PF: > { %p15_p10 = scmp.ge.s32.totalorder %s2539_s23, 5   ;;  %s3316_s18 = smov %s2461_s19 }
 0x7e0   : > { %s3317_s19 = smov %s2465_s20  ;;  %s3318_s20 = smov %s2549_s26 }
 0x7e1   : > { %s3319_s21 = smov %s2539_s23  ;;  %17 = sbr.rel (!%p15_p10) target bundleno = 6 (0x6), region = 115 }
 0x7e8   :  { %1405 = vsyncpa [#allocation5], 1 }
 0x7e9   :  { %1407 = vsyncpa [#allocation5 + $0x1], 1 }
 0x7ea   :  { %1408 = vsyncpa [#allocation8], 1 }
 0x7eb   :  { %1409 = vsyncpa [#allocation6], 1 }
 0x7ec   :  { %1411 = vsyncpa [#allocation6 + $0x1], 1 }
 0x7ed   :  { %1412 = vsyncmov [#allocation3] }
 0x7f0   :  { %s1413_s22 = vpop.sfrf %1412 }
 0x7f1   :  { %p1511_p11 = scmp.ne.s32.totalorder %s1413_s22, 0 }
 0x7f3   :  { %1417 = shalt.err (%p1511_p11)  }

</bundles_post_ra>
